<compile_context>
chip_gen: v7x
topology: tpu7x:2x2x1
jax: 0.10.0
libtpu: 0.0.40
codegen_flags: <defaults>
</compile_context>

<pallas_src>
import functools

import jax
import jax.numpy as jnp
import numpy as np
from jax.experimental import pallas as pl
from jax.experimental.pallas import tpu as pltpu


def _round_up(x, m):
    return ((x + m - 1) // m) * m


def _num_tensorcores():
    """TensorCores per chip (v7x: 2, v5e/v6e: 1).  Defensive: defaults to 1."""
    try:
        info = pltpu.get_tpu_info()
        for attr in ("num_cores", "num_tensorcores", "tensorcores_per_chip",
                     "cores_per_chip"):
            v = getattr(info, attr, None)
            if isinstance(v, int) and v > 0:
                return v
    except Exception:
        pass
    return 1


# -----------------------------------------------------------------------------
# Pallas kernel: fused Conv3x3(10->32) -> +bias -> ReLU -> [BN folded] -> Conv1x1
# Layout: channels in sublanes, flattened padded pixels in lanes.
# -----------------------------------------------------------------------------
def _fused_conv_kernel(x_main_ref, x_halo_ref, w1_ref, b1_ref, w2_ref, b2_ref,
                       o_ref, xs_ref, col_ref, *, shifts):
    # x_main_ref: (Cin, TM)              this tile's padded-pixel columns
    # x_halo_ref: (Cin, HALO_BLOCK)      next 128-aligned columns (right halo)
    # w1_ref    : (Cmid, 9*Cin)          conv1 3x3 weights, index [m, k*Cin + c]
    # b1_ref    : (Cmid, 1)              conv1 bias
    # w2_ref    : (Cout, Cmid)           conv2 1x1 weight with BN(eval) scale folded in
    # b2_ref    : (Cout, 1)              conv2 bias with BN(eval) shift folded in
    # o_ref     : (Cout, TM)             logits for TM pixels (lane-dense store)
    # xs_ref    : (Cin, TM+HALO_BLOCK)   VMEM scratch: stitched contiguous window
    # col_ref   : (9*Cin, TM)            VMEM scratch: in-VMEM im2col block
    tm = o_ref.shape[1]
    cin = x_main_ref.shape[0]

    # Stitch main tile + right halo into one contiguous window (aligned stores).
    xs_ref[:, :tm] = x_main_ref[...]
    xs_ref[:, tm:] = x_halo_ref[...]

    # In-VMEM im2col: 9 statically lane-shifted copies stacked along sublanes.
    for k, d in enumerate(shifts):
        col_ref[k * cin:(k + 1) * cin, :] = xs_ref[:, d:d + tm]

    # One fat MXU matmul (K = 9*Cin = 90), bias + ReLU, then the fused 1x1 conv.
    h = jnp.dot(w1_ref[...], col_ref[...], preferred_element_type=jnp.float32)
    h = jnp.maximum(h + b1_ref[...], 0.0)
    out = jnp.dot(w2_ref[...], h, preferred_element_type=jnp.float32) + b2_ref[...]
    o_ref[...] = out.astype(o_ref.dtype)


# -----------------------------------------------------------------------------
# Wrapper: NCHW features -> padded channels-major layout -> Pallas -> NCHW logits
# -----------------------------------------------------------------------------
@functools.partial(jax.jit, static_argnames=("num_classes", "tm"))
def enhanced_logreg_forward(features_nchw, params, *, num_classes, tm=4096):
    """features_nchw: [B, 10, H, W] float32 (output of extract_features).
    Returns logits [B, num_classes, H, W], matching the classifier in eval mode."""
    B, cin, H, W = features_nchw.shape
    hp, wp = H + 2, W + 2
    pp = hp * wp                       # pixels per padded image
    m_valid = B * pp                   # outputs on the padded grid (valid sub-rect kept)

    halo = 2 * wp + 2                  # largest 3x3 tap offset in flattened coords
    halo_block = _round_up(halo, 128)  # 128-aligned halo window -> unmasked DMA/vld

    # ---- tiling (Python ints; static under jit) ----
    tm = _round_up(tm, halo_block)                        # tm % halo_block == 0
    tm = min(tm, _round_up(m_valid, halo_block))          # no pure-garbage tiles
    num_blocks = pl.cdiv(m_valid, tm)
    n_tc = _num_tensorcores()
    if n_tc > 1:                                          # v7x: keep work for both cores
        if num_blocks < n_tc and m_valid > halo_block:
            tm = max(halo_block, _round_up(pl.cdiv(m_valid, n_tc), halo_block))
            num_blocks = pl.cdiv(m_valid, tm)
        num_blocks = _round_up(num_blocks, n_tc)
    m_out = num_blocks * tm
    m_pad = m_out + halo_block                            # width incl. last tile's halo

    # ---- data prep: zero-pad H/W by 1 (Conv2d padding=1); channels-in-sublanes /
    #      flattened padded pixels-in-lanes.  This is the only HBM copy of the
    #      features; per-tile windows (+ halo) are fetched directly by BlockSpec DMA.
    xpad = jnp.pad(features_nchw, ((0, 0), (0, 0), (1, 1), (1, 1)))      # (B, Cin, H+2, W+2)
    xT = jnp.transpose(xpad, (1, 0, 2, 3)).reshape(cin, m_valid)         # col = b*pp + r*wp + c
    xT = jnp.pad(xT, ((0, 0), (0, m_pad - m_valid)))
    assert xT.shape[1] == m_pad and tm % halo_block == 0 and m_pad % halo_block == 0

    # ---- parameters ----
    conv1_w = params["conv1_w"]                               # (Cmid, Cin, 3, 3)
    cmid = conv1_w.shape[0]
    # k-major flattening: w1f[m, k*cin + c] = conv1_w[m, c, kh, kw], k = kh*3 + kw
    w1f = jnp.transpose(conv1_w, (0, 2, 3, 1)).reshape(cmid, 9 * cin)
    b1 = params["conv1_b"].reshape(cmid, 1)
    eps = 1e-5
    bn_scale = params["bn_gamma"] / jnp.sqrt(params["bn_var"] + eps)
    bn_shift = params["bn_beta"] - params["bn_mean"] * bn_scale
    w2 = params["conv2_w"][:, :, 0, 0]                        # (Cout, Cmid)
    w2f = w2 * bn_scale[None, :]                              # BN scale folded in
    b2f = (w2 @ bn_shift + params["conv2_b"]).reshape(num_classes, 1)   # BN shift folded in

    # flattened-pixel offsets of the 3x3 taps (static, baked into the kernel)
    shifts = tuple(kh * wp + kw for kh in range(3) for kw in range(3))
    assert max(shifts) == halo and halo <= halo_block

    ratio = tm // halo_block
    out_flat = pl.pallas_call(
        functools.partial(_fused_conv_kernel, shifts=shifts),
        out_shape=jax.ShapeDtypeStruct((num_classes, m_out), jnp.float32),
        grid=(num_blocks,),
        in_specs=[
            pl.BlockSpec((cin, tm), lambda i: (0, i)),                        # main window
            pl.BlockSpec((cin, halo_block), lambda i: (0, (i + 1) * ratio)),  # right halo
            pl.BlockSpec((cmid, 9 * cin), lambda i: (0, 0)),
            pl.BlockSpec((cmid, 1), lambda i: (0, 0)),
            pl.BlockSpec((num_classes, cmid), lambda i: (0, 0)),
            pl.BlockSpec((num_classes, 1), lambda i: (0, 0)),
        ],
        out_specs=pl.BlockSpec((num_classes, tm), lambda i: (0, i)),
        scratch_shapes=[
            pltpu.VMEM((cin, tm + halo_block), jnp.float32),   # stitched window
            pltpu.VMEM((9 * cin, tm), jnp.float32),            # im2col block
        ],
        compiler_params=pltpu.CompilerParams(
            dimension_semantics=("parallel",),
            vmem_limit_bytes=32 * 1024 * 1024,   # far above this kernel's footprint
        ),
    )(xT, xT, w1f, b1, w2f, b2f)

    # Drop padded-grid garbage columns and return NCHW logits.
    out = out_flat[:, :m_valid].reshape(num_classes, B, hp, wp)[:, :, :H, :W]
    return jnp.transpose(out, (1, 0, 2, 3))


# -----------------------------------------------------------------------------
# Deterministic parameter init (mirrors the module's __init__)
# -----------------------------------------------------------------------------
def init_params(key, num_classes, n_features=10, c_mid=32):
    k1, k2 = jax.random.split(key)
    # kaiming_normal_(mode='fan_out', nonlinearity='relu'): std = sqrt(2 / fan_out)
    fan_out1 = c_mid * 3 * 3
    conv1_w = jax.random.normal(k1, (c_mid, n_features, 3, 3), jnp.float32) * np.sqrt(2.0 / fan_out1)
    fan_out2 = num_classes * 1 * 1
    conv2_w = jax.random.normal(k2, (num_classes, c_mid, 1, 1), jnp.float32) * np.sqrt(2.0 / fan_out2)
    return {
        "conv1_w": conv1_w,
        "conv1_b": jnp.zeros((c_mid,), jnp.float32),
        "bn_gamma": jnp.ones((c_mid,), jnp.float32),
        "bn_beta": jnp.zeros((c_mid,), jnp.float32),
        "bn_mean": jnp.zeros((c_mid,), jnp.float32),   # BatchNorm2d default running stats
        "bn_var": jnp.ones((c_mid,), jnp.float32),
        "conv2_w": conv2_w,
        "conv2_b": jnp.zeros((num_classes,), jnp.float32),
    }


# -----------------------------------------------------------------------------
# Pure-JAX reference (lax conv) for a correctness check
# -----------------------------------------------------------------------------
def reference_forward(features_nchw, params):
    dn = jax.lax.conv_dimension_numbers(features_nchw.shape, params["conv1_w"].shape,
                                        ("NCHW", "OIHW", "NCHW"))
    h = jax.lax.conv_general_dilated(features_nchw, params["conv1_w"], (1, 1),
                                     ((1, 1), (1, 1)), dimension_numbers=dn)
    h = h + params["conv1_b"][None, :, None, None]
    h = jnp.maximum(h, 0.0)
    eps = 1e-5
    scale = params["bn_gamma"] / jnp.sqrt(params["bn_var"] + eps)
    shift = params["bn_beta"] - params["bn_mean"] * scale
    h = h * scale[None, :, None, None] + shift[None, :, None, None]
    dn2 = jax.lax.conv_dimension_numbers(h.shape, params["conv2_w"].shape,
                                         ("NCHW", "OIHW", "NCHW"))
    out = jax.lax.conv_general_dilated(h, params["conv2_w"], (1, 1),
                                       ((0, 0), (0, 0)), dimension_numbers=dn2)
    return out + params["conv2_b"][None, :, None, None]


if __name__ == "__main__":
    num_classes = 3
    B, H, W = 2, 16, 16          # B*(H+2)*(W+2) = 648 padded pixels
    n_features = 10

    key = jax.random.PRNGKey(0)
    kx, kp = jax.random.split(key)
    # Stand-in for extract_features output: [B, 10, H, W] float32 feature maps.
    features = jax.random.normal(kx, (B, n_features, H, W), jnp.float32)
    params = init_params(kp, num_classes)

    logits = enhanced_logreg_forward(features, params, num_classes=num_classes)
    logits = jax.block_until_ready(logits)
    assert logits.shape == (B, num_classes, H, W)
    assert logits.dtype == jnp.float32

    ref = jax.block_until_ready(reference_forward(features, params))
    np.testing.assert_allclose(np.asarray(logits), np.asarray(ref), rtol=1e-4, atol=1e-4)

    print("KERNEL_OK")
</pallas_src>

<mosaic_0001>
module attributes {stable_mosaic.version = 11 : i64} {
  func.func @_fused_conv_kernel(%arg0: i32, %arg1: memref<10x768xf32, #tpu.memory_space<vmem>>, %arg2: memref<10x128xf32, #tpu.memory_space<vmem>>, %arg3: memref<32x90xf32, #tpu.memory_space<vmem>>, %arg4: memref<32x1xf32, #tpu.memory_space<vmem>>, %arg5: memref<3x32xf32, #tpu.memory_space<vmem>>, %arg6: memref<3x1xf32, #tpu.memory_space<vmem>>, %arg7: memref<3x768xf32, #tpu.memory_space<vmem>>, %arg8: memref<10x896xf32, #tpu.memory_space<vmem>>, %arg9: memref<90x768xf32, #tpu.memory_space<vmem>>) attributes {dimension_semantics = [#tpu.dimension_semantics<parallel>], iteration_bounds = array<i64: 1>, scalar_prefetch = 0 : i64, scratch_operands = 2 : i64, tpu.core_type = #tpu.core_type<tc>, window_params = [{transform_indices = @transform_0, window_bounds = array<i64: 10, 768>}, {transform_indices = @transform_1, window_bounds = array<i64: 10, 128>}, {pipeline_mode = #tpu.pipeline_mode<synchronous>, transform_indices = @transform_2, window_bounds = array<i64: 32, 90>}, {pipeline_mode = #tpu.pipeline_mode<synchronous>, transform_indices = @transform_3, window_bounds = array<i64: 32, 1>}, {pipeline_mode = #tpu.pipeline_mode<synchronous>, transform_indices = @transform_4, window_bounds = array<i64: 3, 32>}, {pipeline_mode = #tpu.pipeline_mode<synchronous>, transform_indices = @transform_5, window_bounds = array<i64: 3, 1>}, {transform_indices = @transform_6, window_bounds = array<i64: 3, 768>}]} {
    %c0 = arith.constant 0 : index
    %c0_0 = arith.constant 0 : index
    %0 = vector.load %arg1[%c0, %c0_0] : memref<10x768xf32, #tpu.memory_space<vmem>>, vector<10x768xf32>
    %c0_1 = arith.constant 0 : index
    %c0_2 = arith.constant 0 : index
    %1 = vector.load %arg8[%c0_1, %c0_2] : memref<10x896xf32, #tpu.memory_space<vmem>>, vector<10x768xf32>
    tpu.vector_store %arg8[%c0_1, %c0_2], %0 {strides = array<i32>} : memref<10x896xf32, #tpu.memory_space<vmem>>, vector<10x768xf32>,
    %c0_3 = arith.constant 0 : index
    %c0_4 = arith.constant 0 : index
    %2 = vector.load %arg2[%c0_3, %c0_4] : memref<10x128xf32, #tpu.memory_space<vmem>>, vector<10x128xf32>
    %c0_5 = arith.constant 0 : index
    %c768 = arith.constant 768 : index
    %3 = vector.load %arg8[%c0_5, %c768] : memref<10x896xf32, #tpu.memory_space<vmem>>, vector<10x128xf32>
    tpu.vector_store %arg8[%c0_5, %c768], %2 {strides = array<i32>} : memref<10x896xf32, #tpu.memory_space<vmem>>, vector<10x128xf32>,
    %c0_6 = arith.constant 0 : index
    %c0_7 = arith.constant 0 : index
    %4 = vector.load %arg8[%c0_6, %c0_7] : memref<10x896xf32, #tpu.memory_space<vmem>>, vector<10x768xf32>
    %c0_8 = arith.constant 0 : index
    %c0_9 = arith.constant 0 : index
    %5 = vector.load %arg9[%c0_8, %c0_9] : memref<90x768xf32, #tpu.memory_space<vmem>>, vector<10x768xf32>
    tpu.vector_store %arg9[%c0_8, %c0_9], %4 {strides = array<i32>} : memref<90x768xf32, #tpu.memory_space<vmem>>, vector<10x768xf32>,
    %c0_10 = arith.constant 0 : index
    %c1 = arith.constant 1 : index
    %6 = vector.load %arg8[%c0_10, %c1] : memref<10x896xf32, #tpu.memory_space<vmem>>, vector<10x768xf32>
    %c10 = arith.constant 10 : index
    %c0_11 = arith.constant 0 : index
    %7 = vector.load %arg9[%c10, %c0_11] : memref<90x768xf32, #tpu.memory_space<vmem>>, vector<10x768xf32>
    tpu.vector_store %arg9[%c10, %c0_11], %6 {strides = array<i32>} : memref<90x768xf32, #tpu.memory_space<vmem>>, vector<10x768xf32>,
    %c0_12 = arith.constant 0 : index
    %c2 = arith.constant 2 : index
    %8 = vector.load %arg8[%c0_12, %c2] : memref<10x896xf32, #tpu.memory_space<vmem>>, vector<10x768xf32>
    %c20 = arith.constant 20 : index
    %c0_13 = arith.constant 0 : index
    %9 = vector.load %arg9[%c20, %c0_13] : memref<90x768xf32, #tpu.memory_space<vmem>>, vector<10x768xf32>
    tpu.vector_store %arg9[%c20, %c0_13], %8 {strides = array<i32>} : memref<90x768xf32, #tpu.memory_space<vmem>>, vector<10x768xf32>,
    %c0_14 = arith.constant 0 : index
    %c18 = arith.constant 18 : index
    %10 = vector.load %arg8[%c0_14, %c18] : memref<10x896xf32, #tpu.memory_space<vmem>>, vector<10x768xf32>
    %c30 = arith.constant 30 : index
    %c0_15 = arith.constant 0 : index
    %11 = vector.load %arg9[%c30, %c0_15] : memref<90x768xf32, #tpu.memory_space<vmem>>, vector<10x768xf32>
    tpu.vector_store %arg9[%c30, %c0_15], %10 {strides = array<i32>} : memref<90x768xf32, #tpu.memory_space<vmem>>, vector<10x768xf32>,
    %c0_16 = arith.constant 0 : index
    %c19 = arith.constant 19 : index
    %12 = vector.load %arg8[%c0_16, %c19] : memref<10x896xf32, #tpu.memory_space<vmem>>, vector<10x768xf32>
    %c40 = arith.constant 40 : index
    %c0_17 = arith.constant 0 : index
    %13 = vector.load %arg9[%c40, %c0_17] : memref<90x768xf32, #tpu.memory_space<vmem>>, vector<10x768xf32>
    tpu.vector_store %arg9[%c40, %c0_17], %12 {strides = array<i32>} : memref<90x768xf32, #tpu.memory_space<vmem>>, vector<10x768xf32>,
    %c0_18 = arith.constant 0 : index
    %c20_19 = arith.constant 20 : index
    %14 = vector.load %arg8[%c0_18, %c20_19] : memref<10x896xf32, #tpu.memory_space<vmem>>, vector<10x768xf32>
    %c50 = arith.constant 50 : index
    %c0_20 = arith.constant 0 : index
    %15 = vector.load %arg9[%c50, %c0_20] : memref<90x768xf32, #tpu.memory_space<vmem>>, vector<10x768xf32>
    tpu.vector_store %arg9[%c50, %c0_20], %14 {strides = array<i32>} : memref<90x768xf32, #tpu.memory_space<vmem>>, vector<10x768xf32>,
    %c0_21 = arith.constant 0 : index
    %c36 = arith.constant 36 : index
    %16 = vector.load %arg8[%c0_21, %c36] : memref<10x896xf32, #tpu.memory_space<vmem>>, vector<10x768xf32>
    %c60 = arith.constant 60 : index
    %c0_22 = arith.constant 0 : index
    %17 = vector.load %arg9[%c60, %c0_22] : memref<90x768xf32, #tpu.memory_space<vmem>>, vector<10x768xf32>
    tpu.vector_store %arg9[%c60, %c0_22], %16 {strides = array<i32>} : memref<90x768xf32, #tpu.memory_space<vmem>>, vector<10x768xf32>,
    %c0_23 = arith.constant 0 : index
    %c37 = arith.constant 37 : index
    %18 = vector.load %arg8[%c0_23, %c37] : memref<10x896xf32, #tpu.memory_space<vmem>>, vector<10x768xf32>
    %c70 = arith.constant 70 : index
    %c0_24 = arith.constant 0 : index
    %19 = vector.load %arg9[%c70, %c0_24] : memref<90x768xf32, #tpu.memory_space<vmem>>, vector<10x768xf32>
    tpu.vector_store %arg9[%c70, %c0_24], %18 {strides = array<i32>} : memref<90x768xf32, #tpu.memory_space<vmem>>, vector<10x768xf32>,
    %c0_25 = arith.constant 0 : index
    %c38 = arith.constant 38 : index
    %20 = vector.load %arg8[%c0_25, %c38] : memref<10x896xf32, #tpu.memory_space<vmem>>, vector<10x768xf32>
    %c80 = arith.constant 80 : index
    %c0_26 = arith.constant 0 : index
    %21 = vector.load %arg9[%c80, %c0_26] : memref<90x768xf32, #tpu.memory_space<vmem>>, vector<10x768xf32>
    tpu.vector_store %arg9[%c80, %c0_26], %20 {strides = array<i32>} : memref<90x768xf32, #tpu.memory_space<vmem>>, vector<10x768xf32>,
    %c0_27 = arith.constant 0 : index
    %c0_28 = arith.constant 0 : index
    %22 = vector.load %arg3[%c0_27, %c0_28] : memref<32x90xf32, #tpu.memory_space<vmem>>, vector<32x90xf32>
    %c0_29 = arith.constant 0 : index
    %c0_30 = arith.constant 0 : index
    %23 = vector.load %arg9[%c0_29, %c0_30] : memref<90x768xf32, #tpu.memory_space<vmem>>, vector<90x768xf32>
    %cst = arith.constant dense<0.000000e+00> : vector<32x768xf32>
    %24 = tpu.matmul %22, %23, %cst {dimension_numbers = #tpu.dot_dimension_numbers<[1], [0], [0], [1], [0, 0, 1, 1], [], []>} : vector<32x90xf32>, vector<90x768xf32>, vector<32x768xf32> -> vector<32x768xf32>
    %c0_31 = arith.constant 0 : index
    %c0_32 = arith.constant 0 : index
    %25 = vector.load %arg4[%c0_31, %c0_32] : memref<32x1xf32, #tpu.memory_space<vmem>>, vector<32x1xf32>
    %26 = vector.broadcast %25 : vector<32x1xf32> to vector<32x768xf32>
    %27 = arith.addf %24, %26 : vector<32x768xf32>
    %cst_33 = arith.constant 0.000000e+00 : f32
    %28 = vector.broadcast %cst_33 : f32 to vector<32x768xf32>
    %29 = arith.maximumf %27, %28 : vector<32x768xf32>
    %c0_34 = arith.constant 0 : index
    %c0_35 = arith.constant 0 : index
    %30 = vector.load %arg5[%c0_34, %c0_35] : memref<3x32xf32, #tpu.memory_space<vmem>>, vector<3x32xf32>
    %cst_36 = arith.constant dense<0.000000e+00> : vector<3x768xf32>
    %31 = tpu.matmul %30, %29, %cst_36 {dimension_numbers = #tpu.dot_dimension_numbers<[1], [0], [0], [1], [0, 0, 1, 1], [], []>} : vector<3x32xf32>, vector<32x768xf32>, vector<3x768xf32> -> vector<3x768xf32>
    %c0_37 = arith.constant 0 : index
    %c0_38 = arith.constant 0 : index
    %32 = vector.load %arg6[%c0_37, %c0_38] : memref<3x1xf32, #tpu.memory_space<vmem>>, vector<3x1xf32>
    %33 = vector.broadcast %32 : vector<3x1xf32> to vector<3x768xf32>
    %34 = arith.addf %31, %33 : vector<3x768xf32>
    %c0_39 = arith.constant 0 : index
    %c0_40 = arith.constant 0 : index
    %35 = vector.load %arg7[%c0_39, %c0_40] : memref<3x768xf32, #tpu.memory_space<vmem>>, vector<3x768xf32>
    tpu.vector_store %arg7[%c0_39, %c0_40], %34 {strides = array<i32>} : memref<3x768xf32, #tpu.memory_space<vmem>>, vector<3x768xf32>,
    return
  }
  func.func @transform_0(%arg0: i32) -> (i32, i32) {
    %c0_i32 = arith.constant 0 : i32
    %c0_i32_0 = arith.constant 0 : i32
    return %c0_i32, %arg0 : i32, i32
  }
  func.func @transform_1(%arg0: i32) -> (i32, i32) {
    %c1_i32 = arith.constant 1 : i32
    %0 = arith.addi %arg0, %c1_i32 : i32
    %c6_i32 = arith.constant 6 : i32
    %1 = arith.muli %0, %c6_i32 : i32
    %c0_i32 = arith.constant 0 : i32
    %c0_i32_0 = arith.constant 0 : i32
    return %c0_i32, %1 : i32, i32
  }
  func.func @transform_2(%arg0: i32) -> (i32, i32) {
    %c0_i32 = arith.constant 0 : i32
    %c0_i32_0 = arith.constant 0 : i32
    %c0_i32_1 = arith.constant 0 : i32
    return %c0_i32, %c0_i32_0 : i32, i32
  }
  func.func @transform_3(%arg0: i32) -> (i32, i32) {
    %c0_i32 = arith.constant 0 : i32
    %c0_i32_0 = arith.constant 0 : i32
    %c0_i32_1 = arith.constant 0 : i32
    return %c0_i32, %c0_i32_0 : i32, i32
  }
  func.func @transform_4(%arg0: i32) -> (i32, i32) {
    %c0_i32 = arith.constant 0 : i32
    %c0_i32_0 = arith.constant 0 : i32
    %c0_i32_1 = arith.constant 0 : i32
    return %c0_i32, %c0_i32_0 : i32, i32
  }
  func.func @transform_5(%arg0: i32) -> (i32, i32) {
    %c0_i32 = arith.constant 0 : i32
    %c0_i32_0 = arith.constant 0 : i32
    %c0_i32_1 = arith.constant 0 : i32
    return %c0_i32, %c0_i32_0 : i32, i32
  }
  func.func @transform_6(%arg0: i32) -> (i32, i32) {
    %c0_i32 = arith.constant 0 : i32
    %c0_i32_0 = arith.constant 0 : i32
    return %c0_i32, %arg0 : i32, i32
  }
}

</mosaic_0001>

<bundles_post_ra>
// kernel: enhanced_logreg_forward.1
= control target key start
LH: loop header
LB: loop body
LE: loop exit
PB: predicated region body
PF: predicated region fallthrough
CT: control target
= control target key end

     0   :  { %s1845_s9 = smov 127   ;;  %s1846_s24 = smov 126   ;;  %vm188_vm0 = vcmask 1041408   ;;  %vm303_vm1 = vcmask 1043456   ;;  %vm418_vm2 = vcmask 1045504   ;;  %vm238_vm3 = vcmask 1039360   ;;  %s2633_s0 = inlined_call_operand.vmem [shape: f32[10,896], index: 0, kind: input, shape index: {}, may-alias: {0,1}]   ;;  %s2634_s1 = inlined_call_operand.vmem [shape: f32[10,896], index: 1, kind: input, shape index: {}, may-alias: {0,1}]   ;;  %s2635_s2 = inlined_call_operand.vmem [shape: f32[32,90], index: 2, kind: input, shape index: {}]   ;;  %s2636_s3 = inlined_call_operand.vmem [shape: f32[32,1], index: 3, kind: input, shape index: {}]   ;;  %s2637_s4 = inlined_call_operand.vmem [shape: f32[3,32], index: 4, kind: input, shape index: {}]   ;;  %s2638_s5 = inlined_call_operand.vmem [shape: f32[3,1], index: 5, kind: input, shape index: {}]   ;;  %s2639_s6 = inlined_call_operand.vmem [shape: f32[3,768], index: 6, kind: output, shape index: {}]  }
   0x1   :  { %v1894_v0 = vld [vmem:[%s2633_s0 + $0x8] sm:$0xff]  ;;  %v1899_v1 = vld [vmem:[%s2633_s0] sm:$0xff]  ;;  %v1904_v2 = vld [vmem:[%s2633_s0 + $0x10] sm:$0xff]  ;;  %s1849_s27 = smov 108   ;;  %s1850_s28 = smov 92   ;;  %vm353_vm4 = vcmask 1031168  }
   0x2   :  { %v1907_v3 = vrot.slane %v1894_v0, 6  ;;  %v1910_v4 = vrot.slane %v1899_v1, 6  ;;  %122 = vst [vmem:[#allocation2 + $0x10] sm:$0xff] %v1904_v2  ;;  %v39_v5 = vld [vmem:[%s2633_s0 + $0x40] sm:$0xff]  ;;  %v41_v6 = vld [vmem:[%s2633_s0 + $0x48] sm:$0xff]  ;;  %v37_v7 = vld [vmem:[%s2633_s0 + $0x38] sm:$0xff] }
   0x3   :  { %40 = vst [vmem:[#allocation4 + $0x38] sm:$0xff] %v39_v5  ;;  %v1927_v8 = vrot.slane %v1904_v2, 6  ;;  %v1930_v9 = vrot.slane %v1894_v0, 4  ;;  %42 = vst [vmem:[#allocation4 + $0x40] sm:$0xff] %v41_v6  ;;  %v1935_v10 = vld [vmem:[%s2633_s0 + $0x18] sm:$0xff]  ;;  %v1940_v11 = vld [vmem:[%s2633_s0 + $0x20] sm:$0xff] }
   0x4   :  { %212 = vrot.lane.b32.xlu0 %v1907_v3, %s1845_s9  ;;  %210 = vrot.lane.b32.xlu1 %v1910_v4, %s1845_s9  ;;  %38 = vst [vmem:[#allocation4 + $0x30] sm:$0xff] %v37_v7  ;;  %v43_v12 = vld [vmem:[%s2633_s0 + $0x50] sm:$0xff]  ;;  %v45_v13 = vld [vmem:[%s2633_s0 + $0x58] sm:$0xff]  ;;  %124 = vst [vmem:[#allocation2 + $0x20] sm:$0xff] %v1940_v11  ;;  %v1968_v17 = vrot.slane %v1904_v2, 4  ;;  %v1971_v18 = vrot.slane %v1894_v0, 2 }
   0x5   :  { %44 = vst [vmem:[#allocation4 + $0x48] sm:$0xff] %v43_v12  ;;  %46 = vst [vmem:[#allocation4 + $0x50] sm:$0xff] %v45_v13  ;;  %v1952_v14 = vld [vmem:[%s2633_s0 + $0x28] sm:$0xff]  ;;  %v1958_v15 = vld [vmem:[%s2634_s1 + $0x30] sm:$0xff]  ;;  %v1981_v23 = vrot.slane %v1904_v2, 2  ;;  %v2000_v44 = vrot.slane %v1899_v1, 4 }
   0x6   :  { %36 = vst [vmem:[#allocation4 + $0x28] sm:$0xff] %v1952_v14  ;;  %v47_v16 = vld [vmem:[%s2633_s0 + $0x60] sm:$0xff]  ;;  %v1707_v19 = vld [vmem:[%s2634_s1 + $0x68] sm:$0xff]  ;;  %s1847_s0 = smov 110   ;;  %v2008_v49 = vrot.slane %v1899_v1, 2  ;;  %s1848_s1 = smov 109  }
   0x7   :  { %48 = vst [vmem:[#allocation4 + $0x58] sm:$0xff] %v47_v16  ;;  %90 = vst [vmem:[#allocation5 + $0x8] sm:$0xff] %v1707_v19  ;;  %s1851_s29 = smov 91   ;;  %s1852_s30 = smov 90   ;;  %vm468_vm5 = vcmask 900096   ;;  %vm561_vm6 = vcmask 891904  }
   0x8   :  { %214 = vrot.lane.b32.xlu0 %v1927_v8, %s1845_s9  ;;  %327 = vrot.lane.b32.xlu1 %v1930_v9, %s1846_s24  ;;  %vm675_vm7 = vcmask 883712   ;;  %vm789_vm8 = vcmask 752640   ;;  %vm903_vm9 = vcmask 744448   ;;  %vm996_vm10 = vcmask 736256  }
   0x9   :  { %vm1855_vm11 = vmmov 1   ;;  %vm1461_vm13 = vcmask 261120  }
   0xa   :  { %v115_v20 = vld [vmem:[#allocation4 + $0x38] sm:$0x3]  ;;  %v116_v21 = vld [vmem:[#allocation4 + $0x40] sm:$0x3]  ;;  %vm2405_vm12 = vmpackc.low %vm188_vm0, %vm1855_vm11 }
   0xb   :  { %127 = vst [vmem:[#allocation2 + $0x40] sm:$0x3] %v115_v20  ;;  %v114_v22 = vld [vmem:[#allocation4 + $0x30] sm:$0x3]  ;;  %128 = vst [vmem:[#allocation2 + $0x48] sm:$0x3] %v116_v21 }
   0xc   :  { %329 = vrot.lane.b32.xlu0 %v1968_v17, %s1846_s24  ;;  %442 = vrot.lane.b32.xlu1 %v1971_v18, %s1847_s0  ;;  %126 = vst [vmem:[#allocation2 + $0x38] sm:$0x3] %v114_v22  ;;  %v117_v24 = vld [vmem:[#allocation4 + $0x48] sm:$0x3]  ;;  %v118_v25 = vld [vmem:[#allocation4 + $0x50] sm:$0x3] }
   0xd   :  { %129 = vst [vmem:[#allocation2 + $0x50] sm:$0x3] %v117_v24  ;;  %130 = vst [vmem:[#allocation2 + $0x58] sm:$0x3] %v118_v25  ;;  %v2051_v22 = vrot.slane %v1935_v10, 6  ;;  %v2053_v24 = vld [vmem:[#allocation2 + $0x10] sm:$0xff] }
   0xe   :  { %v119_v26 = vld [vmem:[#allocation4 + $0x58] sm:$0x3]  ;;  %v133_v27 = vld [vmem:[#allocation5 + $0x8] sm:$0x3]  ;;  %v2058_v25 = vrot.slane %v1940_v11, 6 }
   0xf   :  { %131 = vst [vmem:[#allocation2 + $0x60] sm:$0x3] %v119_v26  ;;  %135 = vst [vmem:[#allocation2 + $0x68] sm:$0x3] %v133_v27 }
  0x10   :  { %444 = vrot.lane.b32.xlu0 %v1981_v23, %s1847_s0 }
  0x12   :  { %v168_v28 = vld [vmem:[#allocation2 + $0x40] sm:$0x3]  ;;  %v169_v31 = vld [vmem:[#allocation2 + $0x48] sm:$0x3] }
  0x13   :  { %v283_v29 = vld [vmem:[#allocation2 + $0x40] sm:$0x3]  ;;  %v198_v30 = vrot.slane %v168_v28, 6  ;;  %v284_v33 = vld [vmem:[#allocation2 + $0x48] sm:$0x3]  ;;  %v200_v34 = vrot.slane %v169_v31, 6 }
  0x14   :  { %v313_v32 = vrot.slane %v283_v29, 4  ;;  %v315_v35 = vrot.slane %v284_v33, 4  ;;  %v167_v36 = vld [vmem:[#allocation2 + $0x38] sm:$0x3]  ;;  %v398_v46 = vld [vmem:[#allocation2 + $0x40] sm:$0x3] }
  0x15   :  { %v199_v37 = vsel %vm188_vm0, %v1907_v3, %v198_v30  ;;  %v201_v38 = vsel %vm188_vm0, %v1927_v8, %v200_v34  ;;  %v196_v40 = vrot.slane %v167_v36, 6  ;;  %v282_v42 = vld [vmem:[#allocation2 + $0x38] sm:$0x3]  ;;  %v399_v47 = vld [vmem:[#allocation2 + $0x48] sm:$0x3]  ;;  %v428_v50 = vrot.slane %v398_v46, 2 }
  0x16   :  { %226 = vrot.lane.b32.xlu1 %v199_v37, %s1845_s9  ;;  %228 = vrot.lane.b32.xlu0 %v201_v38, %s1845_s9  ;;  %v314_v39 = vsel %vm303_vm1, %v1930_v9, %v313_v32  ;;  %v316_v41 = vsel %vm303_vm1, %v1968_v17, %v315_v35  ;;  %v311_v45 = vrot.slane %v282_v42, 4  ;;  %v430_v51 = vrot.slane %v399_v47, 2  ;;  %v143_v52 = vld [vmem:[#allocation2 + $0x40] sm:$0x3]  ;;  %v142_v53 = vld [vmem:[#allocation2 + $0x38] sm:$0x3] }
  0x17   :  { %v197_v43 = vsel %vm188_vm0, %v1910_v4, %v196_v40  ;;  %155 = vst [vmem:[#allocation3 + $0x38] sm:$0x3] %v143_v52  ;;  %154 = vst [vmem:[#allocation3 + $0x30] sm:$0x3] %v142_v53  ;;  %v429_v54 = vsel %vm418_vm2, %v1971_v18, %v428_v50  ;;  %v397_v56 = vld [vmem:[#allocation2 + $0x38] sm:$0x3] }
  0x18   :  { %v312_v48 = vsel %vm303_vm1, %v2000_v44, %v311_v45  ;;  %v431_v55 = vsel %vm418_vm2, %v1981_v23, %v430_v51  ;;  %v426_v57 = vrot.slane %v397_v56, 2  ;;  %v513_v59 = vld [vmem:[#allocation2 + $0x40] sm:$0x3]  ;;  %v514_v60 = vld [vmem:[#allocation2 + $0x48] sm:$0x3]  ;;  %v2098_v47 = vrot.slane %v1940_v11, 4 }
  0x19   :  { %v606_v61 = vld [vmem:[#allocation2 + $0x40] sm:$0x3]  ;;  %v607_v62 = vld [vmem:[#allocation2 + $0x48] sm:$0x3]  ;;  %v605_v12 = vld [vmem:[#allocation2 + $0x38] sm:$0x3] }
  0x1a   :  { %341 = vrot.lane.b32.xlu1 %v314_v39, %s1846_s24  ;;  %343 = vrot.lane.b32.xlu0 %v316_v41, %s1846_s24  ;;  %v427_v58 = vsel %vm418_vm2, %v2008_v49, %v426_v57  ;;  %v635_v63 = vrot.slane %v606_v61, 6  ;;  %v637_v5 = vrot.slane %v607_v62, 6  ;;  %v145_v13 = vld [vmem:[#allocation2 + $0x50] sm:$0x3]  ;;  %v144_v16 = vld [vmem:[#allocation2 + $0x48] sm:$0x3] }
  0x1b   :  { %v512_v19 = vld [vmem:[#allocation2 + $0x38] sm:$0x3]  ;;  %v633_v20 = vrot.slane %v605_v12, 6  ;;  %157 = vst [vmem:[#allocation3 + $0x48] sm:$0x3] %v145_v13  ;;  %v2110_v51 = vrot.slane %v1935_v10, 2 }
  0x1c   :  { %v636_v6 = vsel %vm188_vm0, %v1907_v3, %v635_v63  ;;  %v638_v7 = vsel %vm188_vm0, %v1927_v8, %v637_v5  ;;  %156 = vst [vmem:[#allocation3 + $0x40] sm:$0x3] %v144_v16  ;;  %v721_v21 = vld [vmem:[#allocation2 + $0x48] sm:$0x3]  ;;  %v834_v29 = vld [vmem:[#allocation2 + $0x40] sm:$0x3] }
  0x1d   :  { %v751_v27 = vrot.slane %v721_v21, 4  ;;  %v835_v30 = vld [vmem:[#allocation2 + $0x48] sm:$0x3]  ;;  %v863_v31 = vrot.slane %v834_v29, 2  ;;  %v719_v33 = vld [vmem:[#allocation2 + $0x38] sm:$0x3] }
  0x1e   :  { %224 = vrot.lane.b32.xlu1 %v197_v43, %s1845_s9  ;;  %325 = vrot.lane.b32.xlu0 %v2000_v44, %s1846_s24  ;;  %v865_v32 = vrot.slane %v835_v30, 2  ;;  %v833_v35 = vld [vmem:[#allocation2 + $0x38] sm:$0x3]  ;;  %v170_v36 = vld [vmem:[#allocation2 + $0x50] sm:$0x3]  ;;  %v2114_v52 = vrot.slane %v1940_v11, 2 }
  0x1f   :  { %v752_v28 = vsel %vm303_vm1, %v1968_v17, %v751_v27  ;;  %v861_v38 = vrot.slane %v833_v35, 2  ;;  %v202_v39 = vrot.slane %v170_v36, 6  ;;  %v171_v40 = vld [vmem:[#allocation2 + $0x58] sm:$0x3]  ;;  %v285_v42 = vld [vmem:[#allocation2 + $0x50] sm:$0x3] }
  0x20   :  { %v866_v34 = vsel %vm418_vm2, %v1981_v23, %v865_v32  ;;  %v317_v45 = vrot.slane %v285_v42, 4  ;;  %v286_v46 = vld [vmem:[#allocation2 + $0x58] sm:$0x3]  ;;  %v949_v56 = vld [vmem:[#allocation2 + $0x48] sm:$0x3] }
  0x21   :  { %v203_v41 = vsel %vm188_vm0, %v2051_v22, %v202_v39  ;;  %v146_v53 = vld [vmem:[#allocation2 + $0x58] sm:$0x3]  ;;  %v400_v57 = vld [vmem:[#allocation2 + $0x50] sm:$0x3]  ;;  %v287_v35 = vld [vmem:[#allocation2 + $0x60] sm:$0x3] }
  0x22   :  { %339 = vrot.lane.b32.xlu1 %v312_v48, %s1846_s24  ;;  %440 = vrot.lane.b32.xlu0 %v2008_v49, %s1847_s0  ;;  %v319_v48 = vrot.slane %v286_v46, 4  ;;  %158 = vst [vmem:[#allocation3 + $0x50] sm:$0x3] %v146_v53  ;;  %v947_v61 = vld [vmem:[#allocation2 + $0x38] sm:$0x3]  ;;  %v432_v63 = vrot.slane %v400_v57, 2 }
  0x23   :  { %v401_v5 = vld [vmem:[#allocation2 + $0x58] sm:$0x3]  ;;  %v288_v39 = vld [vmem:[#allocation2 + $0x68] sm:$0x3]  ;;  %v515_v57 = vld [vmem:[#allocation2 + $0x50] sm:$0x3] }
  0x24   :  { %v320_v50 = vsel %vm303_vm1, %v2098_v47, %v319_v48  ;;  %v434_v16 = vrot.slane %v401_v5, 2  ;;  %v2201_v48 = vrot.slane %v1952_v14, 2 }
  0x26   :  { %456 = vrot.lane.b32.xlu1 %v429_v54, %s1847_s0  ;;  %458 = vrot.lane.b32.xlu0 %v431_v55, %s1847_s0  ;;  %v948_v54 = vld [vmem:[#allocation2 + $0x40] sm:$0x3]  ;;  %v435_v21 = vsel %vm418_vm2, %v2114_v52, %v434_v16 }
  0x27   :  { %v147_v55 = vld [vmem:[#allocation2 + $0x60] sm:$0x3] }
  0x28   :  { %159 = vst [vmem:[#allocation3 + $0x58] sm:$0x3] %v147_v55  ;;  %v2208_v55 = vrot.slane %v1958_v15, 2 }
  0x2a   :  { %535 = vrot.lane.b32.xlu1 %v1894_v0, %s1848_s1  ;;  %537 = vrot.lane.b32.xlu0 %v1904_v2, %s1848_s1 }
  0x2e   :  { %454 = vrot.lane.b32.xlu1 %v427_v58, %s1847_s0  ;;  %533 = vrot.lane.b32.xlu0 %v1899_v1, %s1848_s1 }
  0x32   :  { %549 = vrot.lane.b32.xlu1 %v513_v59, %s1848_s1  ;;  %551 = vrot.lane.b32.xlu0 %v514_v60, %s1848_s1  ;;  %v2126_v60 = vld [vmem:[#allocation2 + $0x20] sm:$0xff] }
  0x36   :  { %649 = vrot.lane.b32.xlu1 %v1907_v3, %s1849_s27  ;;  %651 = vrot.lane.b32.xlu0 %v1927_v8, %s1849_s27  ;;  %v634_v3 = vsel %vm188_vm0, %v1910_v4, %v633_v20  ;;  %v720_v8 = vld [vmem:[#allocation2 + $0x40] sm:$0x3]  ;;  %v433_v20 = vsel %vm418_vm2, %v2110_v51, %v432_v63 }
  0x37   :  { %v749_v26 = vrot.slane %v720_v8, 4 }
  0x3a   :  { %663 = vrot.lane.b32.xlu1 %v636_v6, %s1849_s27  ;;  %665 = vrot.lane.b32.xlu0 %v638_v7, %s1849_s27  ;;  %v2136_v6 = vrot.slane %v1958_v15, 6 }
  0x3e   :  { %763 = vrot.lane.b32.xlu1 %v1930_v9, %s1850_s28  ;;  %765 = vrot.lane.b32.xlu0 %v1968_v17, %s1850_s28  ;;  %v747_v17 = vrot.slane %v719_v33, 4 }
  0x40   :  { %v748_v37 = vsel %vm303_vm1, %v2000_v44, %v747_v17 }
  0x42   :  { %547 = vrot.lane.b32.xlu1 %v512_v19, %s1848_s1  ;;  %647 = vrot.lane.b32.xlu0 %v1910_v4, %s1849_s27  ;;  %v750_v4 = vsel %vm303_vm1, %v1930_v9, %v749_v26  ;;  %v864_v9 = vsel %vm418_vm2, %v1971_v18, %v863_v31  ;;  %v1853_v19 = vmov 0.0  }
  0x43   :  { %1227 = vmatprep.mubr.f32.mxu0 %v1853_v19  ;;  %1316 = vmatprep.mubr.f32.mxu1 %v1853_v19 }
  0x46   :  { %661 = vrot.lane.b32.xlu1 %v634_v3, %s1849_s27  ;;  %761 = vrot.lane.b32.xlu0 %v2000_v44, %s1850_s28  ;;  %v2094_v44 = vrot.slane %v1935_v10, 4  ;;  %v172_v3 = vld [vmem:[#allocation2 + $0x60] sm:$0x3] }
  0x4a   :  { %216 = vrot.lane.b32.xlu1 %v2051_v22, %s1845_s9  ;;  %218 = vrot.lane.b32.xlu0 %v2058_v25, %s1845_s9 }
  0x4e   :  { %777 = vrot.lane.b32.xlu1 %v750_v4, %s1850_s28  ;;  %779 = vrot.lane.b32.xlu0 %v752_v28, %s1850_s28  ;;  %v206_v4 = vrot.slane %v172_v3, 6  ;;  %v173_v28 = vld [vmem:[#allocation2 + $0x68] sm:$0x3]  ;;  %v609_v3 = vld [vmem:[#allocation2 + $0x58] sm:$0x3] }
  0x4f   :  { %v208_v32 = vrot.slane %v173_v28, 6 }
  0x51   :  { %v209_v36 = vsel %vm188_vm0, %v2136_v6, %v208_v32 }
  0x52   :  { %877 = vrot.lane.b32.xlu1 %v1971_v18, %s1851_s29  ;;  %879 = vrot.lane.b32.xlu0 %v1981_v23, %s1851_s29  ;;  %v862_v18 = vsel %vm418_vm2, %v2008_v49, %v861_v38  ;;  %v204_v23 = vrot.slane %v171_v40, 6  ;;  %v321_v38 = vrot.slane %v287_v35, 4 }
  0x54   :  { %v205_v43 = vsel %vm188_vm0, %v2058_v25, %v204_v23  ;;  %v323_v23 = vrot.slane %v288_v39, 4 }
  0x56   :  { %891 = vrot.lane.b32.xlu1 %v864_v9, %s1851_s29  ;;  %893 = vrot.lane.b32.xlu0 %v866_v34, %s1851_s29 }
  0x5a   :  { %775 = vrot.lane.b32.xlu1 %v748_v37, %s1850_s28  ;;  %875 = vrot.lane.b32.xlu0 %v2008_v49, %s1851_s29  ;;  %v318_v49 = vsel %vm303_vm1, %v2094_v44, %v317_v45  ;;  %v2177_v37 = vrot.slane %v1952_v14, 4 }
  0x5c   :  { %v322_v42 = vsel %vm303_vm1, %v2177_v37, %v321_v38 }
  0x5e   :  { %889 = vrot.lane.b32.xlu1 %v862_v18, %s1851_s29  ;;  %230 = vrot.lane.b32.xlu0 %v203_v41, %s1845_s9  ;;  %v2185_v18 = vrot.slane %v1958_v15, 4 }
  0x60   :  { %v324_v46 = vsel %vm303_vm1, %v2185_v18, %v323_v23 }
  0x62   :  { %232 = vrot.lane.b32.xlu1 %v205_v43, %s1845_s9  ;;  %331 = vrot.lane.b32.xlu0 %v2094_v44, %s1846_s24 }
  0x66   :  { %333 = vrot.lane.b32.xlu1 %v2098_v47, %s1846_s24  ;;  %345 = vrot.lane.b32.xlu0 %v318_v49, %s1846_s24 }
  0x6a   :  { %347 = vrot.lane.b32.xlu1 %v320_v50, %s1846_s24  ;;  %446 = vrot.lane.b32.xlu0 %v2110_v51, %s1847_s0 }
  0x6e   :  { %448 = vrot.lane.b32.xlu1 %v2114_v52, %s1847_s0  ;;  %970 = vrot.lane.b32.xlu0 %v1894_v0, %s1852_s30 }
  0x72   :  { %972 = vrot.lane.b32.xlu1 %v1904_v2, %s1852_s30  ;;  %984 = vrot.lane.b32.xlu0 %v948_v54, %s1852_s30  ;;  %v2132_v2 = vrot.slane %v1952_v14, 6 }
  0x74   :  { %v207_v17 = vsel %vm188_vm0, %v2132_v2, %v206_v4 }
  0x76   :  { %986 = vrot.lane.b32.xlu1 %v949_v56, %s1852_s30  ;;  %v213_v58 = vpop.permute.xlu0 %212  ;;  %v211_v59 = vpop.permute.xlu1 %210  ;;  %968 = vrot.lane.b32.xlu0 %v1899_v1, %s1852_s30 }
  0x77   :  { %v239_v62 = vsel %vm238_vm3, %v211_v59, %v213_v58 }
  0x78   :  { %263 = vst [vmem:[#allocation3 + $0x30] sm:$0xfc] %v239_v62 }
  0x7a   :  { %982 = vrot.lane.b32.xlu1 %v947_v61, %s1852_s30  ;;  %v2138_v7 = vpop.permute.xlu0 %214  ;;  %v2140_v12 = vpop.permute.xlu1 %327  ;;  %220 = vrot.lane.b32.xlu0 %v2132_v2, %s1845_s9  ;;  %v608_v61 = vld [vmem:[#allocation2 + $0x50] sm:$0x3] }
  0x7b   :  { %v240_v13 = vsel %vm238_vm3, %v213_v58, %v2138_v7 }
  0x7c   :  { %264 = vst [vmem:[#allocation3 + $0x38] sm:$0xfc] %v240_v13 }
  0x7e   :  { %222 = vrot.lane.b32.xlu1 %v2136_v6, %s1845_s9  ;;  %v2152_v8 = vpop.permute.xlu0 %329  ;;  %460 = vrot.lane.b32.xlu0 %v433_v20, %s1847_s0  ;;  %v443_v27 = vpop.permute.xlu1 %442  ;;  %v639_v20 = vrot.slane %v608_v61, 6 }
  0x7f   :  { %v355_v26 = vsel %vm353_vm4, %v2140_v12, %v2152_v8  ;;  %v1043_v29 = vld [vmem:[#allocation3 + $0x30] sm:$0xff] }
  0x80   :  { %379 = vst [vmem:[#allocation3 + $0x68] sm:$0xf0] %v355_v26  ;;  %v1731_v9 = vpack.c.bf16 %v1043_v29, %v1899_v1  ;;  %v640_v28 = vsel %vm188_vm0, %v2051_v22, %v639_v20 }
  0x82   :  { %462 = vrot.lane.b32.xlu1 %v435_v21, %s1847_s0  ;;  %v2161_v30 = vpop.permute.xlu0 %444  ;;  %539 = vrot.lane.b32.xlu0 %v1935_v10, %s1848_s1 }
  0x83   :  { %v470_v31 = vsel %vm468_vm5, %v443_v27, %v2161_v30  ;;  %v1044_v33 = vld [vmem:[#allocation3 + $0x38] sm:$0xff] }
  0x84   :  { %494 = vst [vmem:[#allocation3 + $0x98] sm:$0xc0] %v470_v31  ;;  %v1729_v34 = vpack.c.bf16 %v1044_v33, %v1894_v0  ;;  %v402_v31 = vld [vmem:[#allocation2 + $0x60] sm:$0x3] }
  0x86   :  { %541 = vrot.lane.b32.xlu1 %v1940_v11, %s1848_s1  ;;  %1730 = vmatprep.subr.bf16.mxu0 %v1729_v34 }
  0x87   :  { %234 = vrot.lane.b32.xlu0 %v207_v17, %s1845_s9  ;;  %1732 = vmatpush1.bf16.msra.mxu0 %v1731_v9 }
  0x88   :  { %v227_v1 = vpop.permute.xlu1 %226  ;;  %v2179_v40 = vpop.permute.xlu0 %228 }
  0x89   :  { %v246_v0 = vsel %vm238_vm3, %v227_v1, %v2179_v40 }
  0x8a   :  { %236 = vrot.lane.b32.xlu1 %v209_v36, %s1845_s9  ;;  %270 = vst [vmem:[#allocation3 + $0x68] sm:$0xf] %v246_v0 }
  0x8b   :  { %335 = vrot.lane.b32.xlu0 %v2177_v37, %s1846_s24 }
  0x8c   :  { %v342_v41 = vpop.permute.xlu1 %341  ;;  %v2191_v43 = vpop.permute.xlu0 %343 }
  0x8d   :  { %v361_v45 = vsel %vm353_vm4, %v342_v41, %v2191_v43 }
  0x8e   :  { %337 = vrot.lane.b32.xlu1 %v2185_v18, %s1846_s24  ;;  %385 = vst [vmem:[#allocation3 + $0x98] sm:$0x3f] %v361_v45 }
  0x8f   :  { %349 = vrot.lane.b32.xlu0 %v322_v42, %s1846_s24 }
  0x90   :  { %v225_v49 = vpop.permute.xlu1 %224  ;;  %v326_v53 = vpop.permute.xlu0 %325 }
  0x91   :  { %v245_v50 = vsel %vm238_vm3, %v225_v49, %v227_v1  ;;  %v354_v54 = vsel %vm353_vm4, %v326_v53, %v2140_v12  ;;  %v1050_v63 = vld [vmem:[#allocation3 + $0x68] sm:$0xff]  ;;  %v403_v1 = vld [vmem:[#allocation2 + $0x68] sm:$0x3] }
  0x92   :  { %269 = vst [vmem:[#allocation3 + $0x60] sm:$0xf] %v245_v50  ;;  %351 = vrot.lane.b32.xlu1 %v324_v46, %s1846_s24  ;;  %378 = vst [vmem:[#allocation3 + $0x60] sm:$0xf0] %v354_v54  ;;  %v516_v12 = vld [vmem:[#allocation2 + $0x58] sm:$0x3] }
  0x93   :  { %450 = vrot.lane.b32.xlu0 %v2201_v48, %s1847_s0  ;;  %v438_v23 = vrot.slane %v403_v1, 2  ;;  %v722_v46 = vld [vmem:[#allocation2 + $0x50] sm:$0x3] }
  0x94   :  { %v340_v56 = vpop.permute.xlu1 %339  ;;  %v441_v59 = vpop.permute.xlu0 %440  ;;  %v753_v54 = vrot.slane %v722_v46, 4 }
  0x95   :  { %v360_v58 = vsel %vm353_vm4, %v340_v56, %v342_v41  ;;  %v469_v62 = vsel %vm468_vm5, %v441_v59, %v443_v27  ;;  %v1056_v5 = vld [vmem:[#allocation3 + $0x98] sm:$0xff]  ;;  %v641_v27 = vrot.slane %v609_v3, 6  ;;  %v439_v50 = vsel %vm418_vm2, %v2208_v55, %v438_v23  ;;  %v723_v56 = vld [vmem:[#allocation2 + $0x58] sm:$0x3] }
  0x96   :  { %384 = vst [vmem:[#allocation3 + $0x90] sm:$0x3f] %v360_v58  ;;  %452 = vrot.lane.b32.xlu1 %v2208_v55, %s1847_s0  ;;  %493 = vst [vmem:[#allocation3 + $0x90] sm:$0xc0] %v469_v62  ;;  %v1733_v13 = vpack.c.bf16 %v1056_v5, %v1050_v63  ;;  %v755_v59 = vrot.slane %v723_v56, 4  ;;  %v754_v62 = vsel %vm303_vm1, %v2094_v44, %v753_v54 }
  0x97   :  { %553 = vrot.lane.b32.xlu0 %v515_v57, %s1848_s1  ;;  %v642_v17 = vsel %vm188_vm0, %v2058_v25, %v641_v27  ;;  %v836_v5 = vld [vmem:[#allocation2 + $0x50] sm:$0x3]  ;;  %v837_v3 = vld [vmem:[#allocation2 + $0x58] sm:$0x3]  ;;  %v611_v23 = vld [vmem:[#allocation2 + $0x68] sm:$0x3] }
  0x98   :  { %v457_v16 = vpop.permute.xlu1 %456  ;;  %v2217_v21 = vpop.permute.xlu0 %458  ;;  %1734 = vmatprep.subr.bf16.mxu0 %v1733_v13  ;;  %v756_v13 = vsel %vm303_vm1, %v2098_v47, %v755_v59  ;;  %v867_v20 = vrot.slane %v836_v5, 2  ;;  %v869_v27 = vrot.slane %v837_v3, 2  ;;  %v645_v46 = vrot.slane %v611_v23, 6  ;;  %v724_v3 = vld [vmem:[#allocation2 + $0x60] sm:$0x3] }
  0x99   :  { %v476_v26 = vsel %vm468_vm5, %v457_v16, %v2217_v21  ;;  %v1049_v33 = vld [vmem:[#allocation3 + $0x60] sm:$0xff] }
  0x9a   :  { %555 = vrot.lane.b32.xlu1 %v516_v12, %s1848_s1 }
  0x9b   :  { %653 = vrot.lane.b32.xlu0 %v2051_v22, %s1849_s27  ;;  %v436_v22 = vrot.slane %v402_v31, 2 }
  0x9c   :  { %v536_v4 = vpop.permute.xlu1 %535  ;;  %v2226_v29 = vpop.permute.xlu0 %537 }
  0x9d   :  { %v563_v32 = vsel %vm561_vm6, %v536_v4, %v2226_v29  ;;  %v1055_v9 = vld [vmem:[#allocation3 + $0x90] sm:$0xff]  ;;  %v437_v42 = vsel %vm418_vm2, %v2201_v48, %v436_v22 }
  0x9e   :  { %655 = vrot.lane.b32.xlu1 %v2058_v25, %s1849_s27  ;;  %v1735_v34 = vpack.c.bf16 %v1055_v9, %v1049_v33  ;;  %v1737_v35 = vpack.c.bf16 %v563_v32, %v476_v26  ;;  %v870_v33 = vsel %vm418_vm2, %v2114_v52, %v869_v27  ;;  %v950_v27 = vld [vmem:[#allocation2 + $0x50] sm:$0x3] }
  0x9f   :  { %667 = vrot.lane.b32.xlu0 %v640_v28, %s1849_s27 }
  0xa0   :  { %v455_v36 = vpop.permute.xlu1 %454  ;;  %v534_v39 = vpop.permute.xlu0 %533  ;;  %1736 = vmatpush1.bf16.msra.mxu0 %v1735_v34 }
  0xa1   :  { %v475_v38 = vsel %vm468_vm5, %v455_v36, %v457_v16  ;;  %v562_v0 = vsel %vm561_vm6, %v534_v39, %v536_v4  ;;  %1738 = vmatprep.subr.bf16.mxu0 %v1737_v35  ;;  %v610_v35 = vld [vmem:[#allocation2 + $0x60] sm:$0x3] }
  0xa2   :  { %669 = vrot.lane.b32.xlu1 %v642_v17, %s1849_s27  ;;  %v1739_v41 = vpack.c.bf16 %v562_v0, %v475_v38  ;;  %v517_v17 = vld [vmem:[#allocation2 + $0x60] sm:$0x3]  ;;  %v518_v38 = vld [vmem:[#allocation2 + $0x68] sm:$0x3] }
  0xa3   :  { %767 = vrot.lane.b32.xlu0 %v2094_v44, %s1850_s28 }
  0xa4   :  { %v550_v25 = vpop.permute.xlu1 %549  ;;  %v2242_v45 = vpop.permute.xlu0 %551  ;;  %1740 = vmatpush1.bf16.msra.mxu0 %v1739_v41 }
  0xa5   :  { %v569_v49 = vsel %vm561_vm6, %v550_v25, %v2242_v45 }
  0xa6   :  { %769 = vrot.lane.b32.xlu1 %v2098_v47, %s1850_s28  ;;  %593 = vst [vmem:[#allocation3 + $0x128] sm:$0x3] %v569_v49  ;;  %v868_v47 = vsel %vm418_vm2, %v2110_v51, %v867_v20 }
  0xa7   :  { %464 = vrot.lane.b32.xlu0 %v437_v42, %s1847_s0 }
  0xa8   :  { %v650_v53 = vpop.permute.xlu1 %649  ;;  %v2251_v57 = vpop.permute.xlu0 %651 }
  0xa9   :  { %v677_v58 = vsel %vm675_vm7, %v650_v53, %v2251_v57 }
  0xaa   :  { %466 = vrot.lane.b32.xlu1 %v439_v50, %s1847_s0  ;;  %701 = vst [vmem:[#allocation3 + $0x128] sm:$0xfc] %v677_v58  ;;  %v646_v58 = vsel %vm188_vm0, %v2136_v6, %v645_v46 }
  0xab   :  { %543 = vrot.lane.b32.xlu0 %v1952_v14, %s1848_s1 }
  0xac   :  { %v664_v61 = vpop.permute.xlu1 %663  ;;  %v2260_v63 = vpop.permute.xlu0 %665 }
  0xad   :  { %v683_v12 = vsel %vm675_vm7, %v664_v61, %v2260_v63 }
  0xae   :  { %545 = vrot.lane.b32.xlu1 %v1958_v15, %s1848_s1  ;;  %707 = vst [vmem:[#allocation3 + $0x158] sm:$0xf] %v683_v12 }
  0xaf   :  { %781 = vrot.lane.b32.xlu0 %v754_v62, %s1850_s28 }
  0xb0   :  { %v764_v16 = vpop.permute.xlu1 %763  ;;  %v2269_v44 = vpop.permute.xlu0 %765 }
  0xb1   :  { %v791_v26 = vsel %vm789_vm8, %v764_v16, %v2269_v44  ;;  %v1074_v22 = vld [vmem:[#allocation3 + $0x128] sm:$0xff] }
  0xb2   :  { %783 = vrot.lane.b32.xlu1 %v756_v13, %s1850_s28  ;;  %815 = vst [vmem:[#allocation3 + $0x158] sm:$0xf0] %v791_v26 }
  0xb3   :  { %881 = vrot.lane.b32.xlu0 %v2110_v51, %s1851_s29 }
  0xb4   :  { %v548_v4 = vpop.permute.xlu1 %547  ;;  %v648_v31 = vpop.permute.xlu0 %647 }
  0xb5   :  { %v568_v28 = vsel %vm561_vm6, %v548_v4, %v550_v25  ;;  %v676_v32 = vsel %vm675_vm7, %v648_v31, %v650_v53  ;;  %v757_v4 = vrot.slane %v724_v3, 4  ;;  %v1112_v3 = vld [vmem:[%s2636_s3 + $0x18] sm:$0xff] }
  0xb6   :  { %592 = vst [vmem:[#allocation3 + $0x120] sm:$0x3] %v568_v28  ;;  %883 = vrot.lane.b32.xlu1 %v2114_v52, %s1851_s29  ;;  %700 = vst [vmem:[#allocation3 + $0x120] sm:$0xfc] %v676_v32  ;;  %v643_v52 = vrot.slane %v610_v35, 6 }
  0xb7   :  { %895 = vrot.lane.b32.xlu0 %v868_v47, %s1851_s29  ;;  %v725_v47 = vld [vmem:[#allocation2 + $0x68] sm:$0x3] }
  0xb8   :  { %v662_v9 = vpop.permute.xlu1 %661  ;;  %v762_v51 = vpop.permute.xlu0 %761  ;;  %v644_v50 = vsel %vm188_vm0, %v2132_v2, %v643_v52 }
  0xb9   :  { %v682_v34 = vsel %vm675_vm7, %v662_v9, %v664_v61  ;;  %v790_v36 = vsel %vm789_vm8, %v762_v51, %v764_v16  ;;  %v1080_v1 = vld [vmem:[#allocation3 + $0x158] sm:$0xff]  ;;  %v951_v9 = vld [vmem:[#allocation2 + $0x58] sm:$0x3]  ;;  %v758_v51 = vsel %vm303_vm1, %v2177_v37, %v757_v4 }
  0xba   :  { %706 = vst [vmem:[#allocation3 + $0x150] sm:$0xf] %v682_v34  ;;  %897 = vrot.lane.b32.xlu1 %v870_v33, %s1851_s29  ;;  %814 = vst [vmem:[#allocation3 + $0x150] sm:$0xf0] %v790_v36  ;;  %v1741_v39 = vpack.c.bf16 %v1080_v1, %v1074_v22  ;;  %v838_v22 = vld [vmem:[#allocation2 + $0x60] sm:$0x3] }
  0xbb   :  { %557 = vrot.lane.b32.xlu0 %v517_v17, %s1848_s1  ;;  %v759_v17 = vrot.slane %v725_v47, 4 }
  0xbc   :  { %v217_v0 = vpop.permute.xlu1 %216  ;;  %v2291_v25 = vpop.permute.xlu0 %218  ;;  %1742 = vmatprep.subr.bf16.mxu0 %v1741_v39  ;;  %v871_v39 = vrot.slane %v838_v22, 2 }
  0xbd   :  { %v241_v41 = vsel %vm238_vm3, %v2138_v7, %v217_v0  ;;  %v242_v42 = vsel %vm238_vm3, %v217_v0, %v2291_v25  ;;  %v1073_v54 = vld [vmem:[#allocation3 + $0x120] sm:$0xff]  ;;  %v760_v1 = vsel %vm303_vm1, %v2185_v18, %v759_v17 }
  0xbe   :  { %265 = vst [vmem:[#allocation3 + $0x40] sm:$0xfc] %v241_v41  ;;  %559 = vrot.lane.b32.xlu1 %v518_v38, %s1848_s1  ;;  %266 = vst [vmem:[#allocation3 + $0x48] sm:$0xfc] %v242_v42  ;;  %v1854_v42 = vmov 0  }
  0xbf   :  { %657 = vrot.lane.b32.xlu0 %v2132_v2, %s1849_s27  ;;  %1843 = vset.pattern.permute.xlu1 %v1854_v42 }
  0xc0   :  { %v778_v49 = vpop.permute.xlu1 %777  ;;  %v2300_v53 = vpop.permute.xlu0 %779  ;;  %1842 = vset.pattern.permute.xlu0 %v1854_v42 }
  0xc1   :  { %v797_v7 = vsel %vm789_vm8, %v778_v49, %v2300_v53  ;;  %v1079_v56 = vld [vmem:[#allocation3 + $0x150] sm:$0xff] }
  0xc2   :  { %659 = vrot.lane.b32.xlu1 %v2136_v6, %s1849_s27  ;;  %821 = vst [vmem:[#allocation3 + $0x188] sm:$0x3f] %v797_v7  ;;  %v1743_v59 = vpack.c.bf16 %v1079_v56, %v1073_v54 }
  0xc3   :  { %671 = vrot.lane.b32.xlu0 %v644_v50, %s1849_s27 }
  0xc4   :  { %v878_v61 = vpop.permute.xlu1 %877  ;;  %v2309_v2 = vpop.permute.xlu0 %879  ;;  %1744 = vmatpush1.bf16.msra.mxu0 %v1743_v59 }
  0xc5   :  { %v1045_v62 = vld [vmem:[#allocation3 + $0x40] sm:$0xff]  ;;  %v905_v5 = vsel %vm903_vm9, %v878_v61, %v2309_v2  ;;  %v1046_v12 = vld [vmem:[#allocation3 + $0x48] sm:$0xff] }
  0xc6   :  { %673 = vrot.lane.b32.xlu1 %v646_v58, %s1849_s27  ;;  %v1757_v13 = vpack.c.bf16 %v1045_v62, %v2053_v24  ;;  %929 = vst [vmem:[#allocation3 + $0x188] sm:$0xc0] %v905_v5  ;;  %v1755_v6 = vpack.c.bf16 %v1046_v12, %v1935_v10  ;;  %v953_v5 = vld [vmem:[#allocation2 + $0x68] sm:$0x3] }
  0xc7   :  { %771 = vrot.lane.b32.xlu0 %v2177_v37, %s1850_s28  ;;  %v839_v37 = vld [vmem:[#allocation2 + $0x68] sm:$0x3] }
  0xc8   :  { %v892_v16 = vpop.permute.xlu1 %891  ;;  %v2318_v20 = vpop.permute.xlu0 %893  ;;  %1756 = vmatprep.subr.bf16.mxu1 %v1755_v6  ;;  %v873_v41 = vrot.slane %v839_v37, 2 }
  0xc9   :  { %v911_v26 = vsel %vm903_vm9, %v892_v16, %v2318_v20  ;;  %1758 = vmatpush1.bf16.msra.mxu1 %v1757_v13 }
  0xca   :  { %773 = vrot.lane.b32.xlu1 %v2185_v18, %s1850_s28  ;;  %v874_v54 = vsel %vm418_vm2, %v2208_v55, %v873_v41  ;;  %v2429_v41 = vld [vmem:[%s2635_s2] sm:$0xff] }
  0xcb   :  { %974 = vrot.lane.b32.xlu0 %v1935_v10, %s1852_s30 }
  0xcc   :  { %v776_v24 = vpop.permute.xlu1 %775  ;;  %v876_v31 = vpop.permute.xlu0 %875 }
  0xcd   :  { %v796_v28 = vsel %vm789_vm8, %v776_v24, %v778_v49  ;;  %v904_v32 = vsel %vm903_vm9, %v876_v31, %v878_v61  ;;  %v1086_v33 = vld [vmem:[#allocation3 + $0x188] sm:$0xff]  ;;  %v872_v49 = vsel %vm418_vm2, %v2201_v48, %v871_v39  ;;  %v952_v61 = vld [vmem:[#allocation2 + $0x60] sm:$0x3] }
  0xce   :  { %820 = vst [vmem:[#allocation3 + $0x180] sm:$0x3f] %v796_v28  ;;  %976 = vrot.lane.b32.xlu1 %v1940_v11, %s1852_s30  ;;  %928 = vst [vmem:[#allocation3 + $0x180] sm:$0xc0] %v904_v32  ;;  %v1745_v10 = vpack.c.bf16 %v911_v26, %v1086_v33  ;;  %v1111_v33 = vld [vmem:[%s2636_s3 + $0x10] sm:$0xff] }
  0xcf   :  { %988 = vrot.lane.b32.xlu0 %v950_v27, %s1852_s30 }
  0xd0   :  { %v890_v34 = vpop.permute.xlu1 %889  ;;  %v231_v36 = vpop.permute.xlu0 %230  ;;  %1746 = vmatprep.subr.bf16.mxu0 %v1745_v10 }
  0xd1   :  { %v910_v35 = vsel %vm903_vm9, %v890_v34, %v892_v16  ;;  %v247_v11 = vsel %vm238_vm3, %v2179_v40, %v231_v36 }
  0xd2   :  { %990 = vrot.lane.b32.xlu1 %v951_v9, %s1852_s30  ;;  %271 = vst [vmem:[#allocation3 + $0x70] sm:$0xf] %v247_v11 }
  0xd3   :  { %785 = vrot.lane.b32.xlu0 %v758_v51, %s1850_s28 }
  0xd4   :  { %v2340_v38 = vpop.permute.xlu1 %232  ;;  %v332_v52 = vpop.permute.xlu0 %331 }
  0xd5   :  { %v248_v0 = vsel %vm238_vm3, %v231_v36, %v2340_v38  ;;  %v356_v40 = vsel %vm353_vm4, %v2152_v8, %v332_v52  ;;  %v1085_v23 = vld [vmem:[#allocation3 + $0x180] sm:$0xff] }
  0xd6   :  { %272 = vst [vmem:[#allocation3 + $0x78] sm:$0xf] %v248_v0  ;;  %787 = vrot.lane.b32.xlu1 %v760_v1, %s1850_s28  ;;  %380 = vst [vmem:[#allocation3 + $0x70] sm:$0xf0] %v356_v40  ;;  %v1747_v18 = vpack.c.bf16 %v910_v35, %v1085_v23 }
  0xd7   :  { %885 = vrot.lane.b32.xlu0 %v2201_v48, %s1851_s29 }
  0xd8   :  { %v2349_v46 = vpop.permute.xlu1 %333  ;;  %v346_v7 = vpop.permute.xlu0 %345  ;;  %1748 = vmatpush1.bf16.msra.mxu0 %v1747_v18 }
  0xd9   :  { %v357_v50 = vsel %vm353_vm4, %v332_v52, %v2349_v46  ;;  %v362_v8 = vsel %vm353_vm4, %v2191_v43, %v346_v7 }
  0xda   :  { %381 = vst [vmem:[#allocation3 + $0x78] sm:$0xf0] %v357_v50  ;;  %887 = vrot.lane.b32.xlu1 %v2208_v55, %s1851_s29  ;;  %386 = vst [vmem:[#allocation3 + $0xa0] sm:$0x3f] %v362_v8  ;;  %v1844_v8 = vld [vmem:[#allocation4 + $0x28] sm:$0xff] }
  0xdb   :  { %899 = vrot.lane.b32.xlu0 %v872_v49, %s1851_s29 }
  0xdc   :  { %v2362_v48 = vpop.permute.xlu1 %347  ;;  %v447_v58 = vpop.permute.xlu0 %446 }
  0xdd   :  { %v363_v56 = vsel %vm353_vm4, %v346_v7, %v2362_v48  ;;  %v471_v59 = vsel %vm468_vm5, %v2161_v30, %v447_v58  ;;  %v1051_v31 = vld [vmem:[#allocation3 + $0x70] sm:$0xff] }
  0xde   :  { %387 = vst [vmem:[#allocation3 + $0xa8] sm:$0x3f] %v363_v56  ;;  %901 = vrot.lane.b32.xlu1 %v874_v54, %s1851_s29  ;;  %495 = vst [vmem:[#allocation3 + $0xa0] sm:$0xc0] %v471_v59 }
  0xdf   :  { %978 = vrot.lane.b32.xlu0 %v1952_v14, %s1852_s30  ;;  %v1109_v14 = vld [vmem:[%s2636_s3] sm:$0xff] }
  0xe0   :  { %v2371_v43 = vpop.permute.xlu1 %448  ;;  %v971_v62 = vpop.permute.xlu0 %970 }
  0xe1   :  { %v472_v55 = vsel %vm468_vm5, %v447_v58, %v2371_v43  ;;  %v1052_v27 = vld [vmem:[#allocation3 + $0x78] sm:$0xff] }
  0xe2   :  { %496 = vst [vmem:[#allocation3 + $0xa8] sm:$0xc0] %v472_v55  ;;  %980 = vrot.lane.b32.xlu1 %v1958_v15, %s1852_s30  ;;  %v1110_v15 = vld [vmem:[%s2636_s3 + $0x8] sm:$0xff] }
  0xe3   :  { %992 = vrot.lane.b32.xlu0 %v952_v61, %s1852_s30  ;;  %v2442_v61 = vld [vmem:[%s2635_s2 + $0x8] sm:$0xff] }
  0xe4   :  { %v2378_v30 = vpop.permute.xlu1 %972  ;;  %v985_v13 = vpop.permute.xlu0 %984 }
  0xe5   :  { %v998_v12 = vsel %vm996_vm10, %v971_v62, %v2378_v30  ;;  %v1057_v16 = vld [vmem:[#allocation3 + $0xa0] sm:$0xff] }
  0xe6   :  { %994 = vrot.lane.b32.xlu1 %v953_v5, %s1852_s30  ;;  %v1761_v32 = vpack.c.bf16 %v1057_v16, %v1051_v31  ;;  %v2464_v16 = vld [vmem:[%s2635_s2 + $0x18] sm:$0xff] }
  0xe7   :  { %1115 = vperm.xlu0 %1842, %v1109_v14   ;;  %v2453_v14 = vld [vmem:[%s2635_s2 + $0x10] sm:$0xff] }
  0xe8   :  { %v2389_v6 = vpop.permute.xlu1 %986  ;;  %v969_v24 = vpop.permute.xlu0 %968 }
  0xe9   :  { %v1004_v26 = vsel %vm996_vm10, %v985_v13, %v2389_v6  ;;  %v1058_v4 = vld [vmem:[#allocation3 + $0xa8] sm:$0xff]  ;;  %v997_v47 = vsel %vm996_vm10, %v969_v24, %v971_v62 }
  0xea   :  { %1028 = vst [vmem:[#allocation3 + $0x218] sm:$0x3] %v1004_v26  ;;  %v1759_v28 = vpack.c.bf16 %v1058_v4, %v1052_v27  ;;  %1120 = vperm.xlu1 %1843, %v1110_v15  }
  0xeb   :  { %1130 = vperm.xlu0 %1842, %v1112_v3  }
  0xec   :  { %1760 = vmatprep.subr.bf16.mxu1 %v1759_v28  ;;  %v983_v9 = vpop.permute.xlu1 %982  ;;  %v221_v10 = vpop.permute.xlu0 %220 }
  0xed   :  { %v1003_v17 = vsel %vm996_vm10, %v983_v9, %v985_v13  ;;  %1762 = vmatpush1.bf16.msra.mxu1 %v1761_v32  ;;  %v243_v34 = vsel %vm238_vm3, %v2291_v25, %v221_v10  ;;  %v1455_v25 = vld [vmem:[%s2638_s5] sm:$0x7] }
  0xee   :  { %1027 = vst [vmem:[#allocation3 + $0x210] sm:$0x3] %v1003_v17  ;;  %1125 = vperm.xlu1 %1843, %v1111_v33   ;;  %267 = vst [vmem:[#allocation3 + $0x50] sm:$0xfc] %v243_v34 }
  0xf0   :  { %v223_v51 = vpop.permute.xlu1 %222  ;;  %v461_v36 = vpop.permute.xlu0 %460 }
  0xf1   :  { %v244_v35 = vsel %vm238_vm3, %v221_v10, %v223_v51  ;;  %v1104_v22 = vld [vmem:[#allocation3 + $0x218] sm:$0x3]  ;;  %v477_v1 = vsel %vm468_vm5, %v2217_v21, %v461_v36 }
  0xf2   :  { %268 = vst [vmem:[#allocation3 + $0x58] sm:$0xfc] %v244_v35  ;;  %v1749_v39 = vpack.c.bf16 %v1104_v22, %v998_v12  ;;  %1458 = vperm.xlu1 %1843, %v1455_v25  }
  0xf4   :  { %v2411_v37 = vpop.permute.xlu1 %462  ;;  %1751 = vmatprep.subr.msk.bf16.mxu0 %vm2405_vm12, %v1749_v39  ;;  %v540_v52 = vpop.permute.xlu0 %539 }
  0xf5   :  { %v478_v0 = vsel %vm468_vm5, %v461_v36, %v2411_v37  ;;  %v1103_v40 = vld [vmem:[#allocation3 + $0x210] sm:$0x3]  ;;  %v564_v23 = vsel %vm561_vm6, %v2226_v29, %v540_v52 }
  0xf6   :  { %v1752_v21 = vpack.c.bf16 %v1103_v40, %v997_v47  ;;  %v1047_v42 = vld [vmem:[#allocation3 + $0x50] sm:$0xff]  ;;  %v1765_v55 = vpack.c.bf16 %v564_v23, %v477_v1 }
  0xf7   :  { %v1783_v58 = vpack.c.bf16 %v1047_v42, %v2126_v60 }
  0xf8   :  { %v2422_v18 = vpop.permute.xlu1 %541  ;;  %1754 = vmatpush1.bf16.msk.msra.mxu0 %vm2405_vm12, %v1752_v21 }
  0xf9   :  { %v565_v49 = vsel %vm561_vm6, %v540_v52, %v2422_v18  ;;  %v235_v50 = vpop.permute.xlu0 %234  ;;  %v1048_v7 = vld [vmem:[#allocation3 + $0x58] sm:$0xff] }
  0xfa   :  { %v249_v29 = vsel %vm238_vm3, %v2340_v38, %v235_v50  ;;  %v1781_v54 = vpack.c.bf16 %v1048_v7, %v1844_v8  ;;  %v1763_v56 = vpack.c.bf16 %v565_v49, %v478_v0 }
  0xfb   :  { %1710 = vmatmul.mubr.msk.f32.vlgmr.msra.gmra.mrb[0].mxu0 %vm996_vm10, %v2429_v41  ;;  %273 = vst [vmem:[#allocation3 + $0x80] sm:$0xf] %v249_v29 }
  0xfc   :  { %v237_v59 = vpop.permute.xlu1 %236  ;;  %1782 = vmatprep.subr.bf16.mxu0 %v1781_v54  ;;  %1233 = vmatprep.mubr.f32.mxu0 %v1853_v19 }
  0xfd   :  { %v250_v38 = vsel %vm238_vm3, %v235_v50, %v237_v59  ;;  %1784 = vmatpush1.bf16.msra.mxu0 %v1783_v58  ;;  %v336_v62 = vpop.permute.xlu0 %335  ;;  %1764 = vmatprep.subr.bf16.mxu1 %v1763_v56 }
  0xfe   :  { %274 = vst [vmem:[#allocation3 + $0x88] sm:$0xf] %v250_v38  ;;  %v358_v5 = vsel %vm353_vm4, %v2349_v46, %v336_v62  ;;  %1766 = vmatpush1.bf16.msra.mxu1 %v1765_v55 }
  0xff   :  { %1711 = vmatmul.mubr.msk.f32.gmra.mrb[2].mxu0 %vm996_vm10, %v2442_v61  ;;  %382 = vst [vmem:[#allocation3 + $0x80] sm:$0xf0] %v358_v5 }
 0x100   :  { %v338_v60 = vpop.permute.xlu1 %337  ;;  %1239 = vmatprep.mubr.f32.mxu0 %v1853_v19 }
 0x101   :  { %v359_v12 = vsel %vm353_vm4, %v336_v62, %v338_v60  ;;  %v350_v13 = vpop.permute.xlu0 %349 }
 0x102   :  { %383 = vst [vmem:[#allocation3 + $0x88] sm:$0xf0] %v359_v12  ;;  %v364_v46 = vsel %vm353_vm4, %v2362_v48, %v350_v13 }
 0x103   :  { %1712 = vmatmul.mubr.msk.f32.gmra.mrb[4].mxu0 %vm996_vm10, %v2453_v14  ;;  %388 = vst [vmem:[#allocation3 + $0xb0] sm:$0x3f] %v364_v46 }
 0x104   :  { %v352_v15 = vpop.permute.xlu1 %351  ;;  %1245 = vmatprep.mubr.f32.mxu0 %v1853_v19 }
 0x105   :  { %v365_v3 = vsel %vm353_vm4, %v350_v13, %v352_v15  ;;  %v451_v26 = vpop.permute.xlu0 %450 }
 0x106   :  { %389 = vst [vmem:[#allocation3 + $0xb8] sm:$0x3f] %v365_v3  ;;  %v473_v24 = vsel %vm468_vm5, %v2371_v43, %v451_v26  ;;  %v1053_v36 = vld [vmem:[#allocation3 + $0x80] sm:$0xff] }
 0x107   :  { %1713 = vmatmul.mubr.msk.f32.gmra.mrb[6].mxu0 %vm996_vm10, %v2464_v16  ;;  %497 = vst [vmem:[#allocation3 + $0xb0] sm:$0xc0] %v473_v24 }
 0x108   :  { %v453_v48 = vpop.permute.xlu1 %452  ;;  %1405 = vmatprep.mubr.f32.mxu0 %v1853_v19 }
 0x109   :  { %v474_v27 = vsel %vm468_vm5, %v451_v26, %v453_v48  ;;  %v554_v4 = vpop.permute.xlu0 %553 }
 0x10a   :  { %498 = vst [vmem:[#allocation3 + $0xb8] sm:$0xc0] %v474_v27  ;;  %v570_v47 = vsel %vm561_vm6, %v2242_v45, %v554_v4  ;;  %v1054_v45 = vld [vmem:[#allocation3 + $0x88] sm:$0xff] }
 0x10b   :  { %594 = vst [vmem:[#allocation3 + $0x130] sm:$0x3] %v570_v47 }
 0x10c   :  { %v2475_v28 = vpop.permute.xlu1 %555 }
 0x10d   :  { %v571_v43 = vsel %vm561_vm6, %v554_v4, %v2475_v28  ;;  %v654_v31 = vpop.permute.xlu0 %653 }
 0x10e   :  { %595 = vst [vmem:[#allocation3 + $0x138] sm:$0x3] %v571_v43  ;;  %v678_v32 = vsel %vm675_vm7, %v2251_v57, %v654_v31  ;;  %v1059_v9 = vld [vmem:[#allocation3 + $0xb0] sm:$0xff] }
 0x10f   :  { %702 = vst [vmem:[#allocation3 + $0x130] sm:$0xfc] %v678_v32  ;;  %v1787_v22 = vpack.c.bf16 %v1059_v9, %v1053_v36 }
 0x110   :  { %v2481_v33 = vpop.permute.xlu1 %655 }
 0x111   :  { %v679_v17 = vsel %vm675_vm7, %v654_v31, %v2481_v33  ;;  %v668_v10 = vpop.permute.xlu0 %667  ;;  %v1060_v34 = vld [vmem:[#allocation3 + $0xb8] sm:$0xff] }
 0x112   :  { %703 = vst [vmem:[#allocation3 + $0x138] sm:$0xfc] %v679_v17  ;;  %v684_v51 = vsel %vm675_vm7, %v2260_v63, %v668_v10  ;;  %v1785_v35 = vpack.c.bf16 %v1060_v34, %v1054_v45 }
 0x113   :  { %708 = vst [vmem:[#allocation3 + $0x160] sm:$0xf] %v684_v51 }
 0x114   :  { %v2487_v1 = vpop.permute.xlu1 %669  ;;  %1786 = vmatprep.subr.bf16.mxu0 %v1785_v35 }
 0x115   :  { %v685_v57 = vsel %vm675_vm7, %v668_v10, %v2487_v1  ;;  %1788 = vmatpush1.bf16.msra.mxu0 %v1787_v22  ;;  %v768_v39 = vpop.permute.xlu0 %767 }
 0x116   :  { %709 = vst [vmem:[#allocation3 + $0x168] sm:$0xf] %v685_v57  ;;  %v792_v25 = vsel %vm789_vm8, %v2269_v44, %v768_v39  ;;  %v1075_v59 = vld [vmem:[#allocation3 + $0x130] sm:$0xff] }
 0x117   :  { %816 = vst [vmem:[#allocation3 + $0x160] sm:$0xf0] %v792_v25 }
 0x118   :  { %v2493_v0 = vpop.permute.xlu1 %769 }
 0x119   :  { %v793_v63 = vsel %vm789_vm8, %v768_v39, %v2493_v0  ;;  %v465_v52 = vpop.permute.xlu0 %464  ;;  %v1076_v8 = vld [vmem:[#allocation3 + $0x138] sm:$0xff] }
 0x11a   :  { %817 = vst [vmem:[#allocation3 + $0x168] sm:$0xf0] %v793_v63  ;;  %v479_v40 = vsel %vm468_vm5, %v2411_v37, %v465_v52 }
 0x11c   :  { %v467_v23 = vpop.permute.xlu1 %466 }
 0x11d   :  { %v480_v21 = vsel %vm468_vm5, %v465_v52, %v467_v23  ;;  %v544_v42 = vpop.permute.xlu0 %543 }
 0x11e   :  { %v566_v49 = vsel %vm561_vm6, %v2422_v18, %v544_v42  ;;  %v1081_v44 = vld [vmem:[#allocation3 + $0x160] sm:$0xff] }
 0x11f   :  { %v1769_v55 = vpack.c.bf16 %v1081_v44, %v1075_v59  ;;  %v1791_v38 = vpack.c.bf16 %v566_v49, %v479_v40 }
 0x120   :  { %v546_v50 = vpop.permute.xlu1 %545 }
 0x121   :  { %v567_v7 = vsel %vm561_vm6, %v544_v42, %v546_v50  ;;  %v782_v29 = vpop.permute.xlu0 %781  ;;  %v1082_v54 = vld [vmem:[#allocation3 + $0x168] sm:$0xff] }
 0x122   :  { %v798_v56 = vsel %vm789_vm8, %v2300_v53, %v782_v29  ;;  %v1767_v58 = vpack.c.bf16 %v1082_v54, %v1076_v8  ;;  %v1789_v37 = vpack.c.bf16 %v567_v7, %v480_v21 }
 0x123   :  { %822 = vst [vmem:[#allocation3 + $0x190] sm:$0x3f] %v798_v56 }
 0x124   :  { %1768 = vmatprep.subr.bf16.mxu1 %v1767_v58  ;;  %v784_v62 = vpop.permute.xlu1 %783  ;;  %1790 = vmatprep.subr.bf16.mxu0 %v1789_v37 }
 0x125   :  { %v799_v18 = vsel %vm789_vm8, %v782_v29, %v784_v62  ;;  %1770 = vmatpush1.bf16.msra.mxu1 %v1769_v55  ;;  %v882_v5 = vpop.permute.xlu0 %881  ;;  %1792 = vmatpush1.bf16.msra.mxu0 %v1791_v38 }
 0x126   :  { %823 = vst [vmem:[#allocation3 + $0x198] sm:$0x3f] %v799_v18  ;;  %v906_v60 = vsel %vm903_vm9, %v2309_v2, %v882_v5 }
 0x127   :  { %930 = vst [vmem:[#allocation3 + $0x190] sm:$0xc0] %v906_v60 }
 0x128   :  { %v2508_v53 = vpop.permute.xlu1 %883 }
 0x129   :  { %v907_v12 = vsel %vm903_vm9, %v882_v5, %v2508_v53  ;;  %v896_v13 = vpop.permute.xlu0 %895 }
 0x12a   :  { %931 = vst [vmem:[#allocation3 + $0x198] sm:$0xc0] %v907_v12  ;;  %v912_v46 = vsel %vm903_vm9, %v2318_v20, %v896_v13 }
 0x12c   :  { %v2514_v15 = vpop.permute.xlu1 %897 }
 0x12d   :  { %v913_v3 = vsel %vm903_vm9, %v896_v13, %v2514_v15  ;;  %v558_v26 = vpop.permute.xlu0 %557 }
 0x12e   :  { %v572_v2 = vsel %vm561_vm6, %v2475_v28, %v558_v26  ;;  %v1087_v48 = vld [vmem:[#allocation3 + $0x190] sm:$0xff] }
 0x12f   :  { %596 = vst [vmem:[#allocation3 + $0x140] sm:$0x3] %v572_v2  ;;  %v1773_v31 = vpack.c.bf16 %v912_v46, %v1087_v48 }
 0x130   :  { %v560_v24 = vpop.permute.xlu1 %559 }
 0x131   :  { %v573_v27 = vsel %vm561_vm6, %v558_v26, %v560_v24  ;;  %v658_v4 = vpop.permute.xlu0 %657  ;;  %v1088_v47 = vld [vmem:[#allocation3 + $0x198] sm:$0xff] }
 0x132   :  { %597 = vst [vmem:[#allocation3 + $0x148] sm:$0x3] %v573_v27  ;;  %v680_v20 = vsel %vm675_vm7, %v2481_v33, %v658_v4  ;;  %v1771_v43 = vpack.c.bf16 %v913_v3, %v1088_v47 }
 0x133   :  { %704 = vst [vmem:[#allocation3 + $0x140] sm:$0xfc] %v680_v20 }
 0x134   :  { %v660_v32 = vpop.permute.xlu1 %659  ;;  %1772 = vmatprep.subr.bf16.mxu1 %v1771_v43 }
 0x135   :  { %v681_v9 = vsel %vm675_vm7, %v658_v4, %v660_v32  ;;  %v672_v17 = vpop.permute.xlu0 %671  ;;  %1774 = vmatpush1.bf16.msra.mxu1 %v1773_v31 }
 0x136   :  { %705 = vst [vmem:[#allocation3 + $0x148] sm:$0xfc] %v681_v9  ;;  %v686_v28 = vsel %vm675_vm7, %v2487_v1, %v672_v17 }
 0x137   :  { %710 = vst [vmem:[#allocation3 + $0x170] sm:$0xf] %v686_v28 }
 0x138   :  { %v674_v10 = vpop.permute.xlu1 %673 }
 0x139   :  { %v687_v45 = vsel %vm675_vm7, %v672_v17, %v674_v10  ;;  %v772_v34 = vpop.permute.xlu0 %771 }
 0x13a   :  { %711 = vst [vmem:[#allocation3 + $0x178] sm:$0xf] %v687_v45  ;;  %v794_v33 = vsel %vm789_vm8, %v2493_v0, %v772_v34 }
 0x13b   :  { %818 = vst [vmem:[#allocation3 + $0x170] sm:$0xf0] %v794_v33 }
 0x13c   :  { %v774_v51 = vpop.permute.xlu1 %773 }
 0x13d   :  { %v795_v35 = vsel %vm789_vm8, %v772_v34, %v774_v51  ;;  %v975_v36 = vpop.permute.xlu0 %974  ;;  %v1078_v23 = vld [vmem:[#allocation3 + $0x148] sm:$0xff] }
 0x13e   :  { %819 = vst [vmem:[#allocation3 + $0x178] sm:$0xf0] %v795_v35  ;;  %v999_v22 = vsel %vm996_vm10, %v2378_v30, %v975_v36  ;;  %v1077_v30 = vld [vmem:[#allocation3 + $0x140] sm:$0xff] }
 0x140   :  { %v977_v57 = vpop.permute.xlu1 %976 }
 0x141   :  { %v1000_v1 = vsel %vm996_vm10, %v975_v36, %v977_v57  ;;  %v989_v39 = vpop.permute.xlu0 %988 }
 0x142   :  { %v1005_v25 = vsel %vm996_vm10, %v2389_v6, %v989_v39  ;;  %v1083_v52 = vld [vmem:[#allocation3 + $0x170] sm:$0xff] }
 0x143   :  { %1029 = vst [vmem:[#allocation3 + $0x220] sm:$0x3] %v1005_v25  ;;  %v1795_v50 = vpack.c.bf16 %v1083_v52, %v1077_v30 }
 0x144   :  { %v991_v63 = vpop.permute.xlu1 %990 }
 0x145   :  { %v1006_v0 = vsel %vm996_vm10, %v989_v39, %v991_v63  ;;  %v786_v40 = vpop.permute.xlu0 %785  ;;  %v1084_v21 = vld [vmem:[#allocation3 + $0x178] sm:$0xff] }
 0x146   :  { %1030 = vst [vmem:[#allocation3 + $0x228] sm:$0x3] %v1006_v0  ;;  %v800_v42 = vsel %vm789_vm8, %v784_v62, %v786_v40  ;;  %v1793_v49 = vpack.c.bf16 %v1084_v21, %v1078_v23 }
 0x147   :  { %824 = vst [vmem:[#allocation3 + $0x1a0] sm:$0x3f] %v800_v42 }
 0x148   :  { %v788_v44 = vpop.permute.xlu1 %787  ;;  %1794 = vmatprep.subr.bf16.mxu0 %v1793_v49 }
 0x149   :  { %v801_v7 = vsel %vm789_vm8, %v786_v40, %v788_v44  ;;  %1796 = vmatpush1.bf16.msra.mxu0 %v1795_v50  ;;  %v886_v6 = vpop.permute.xlu0 %885  ;;  %v2598_v50 = vld [vmem:[%s2637_s4] sm:$0x7] }
 0x14a   :  { %825 = vst [vmem:[#allocation3 + $0x1a8] sm:$0x3f] %v801_v7  ;;  %v908_v29 = vsel %vm903_vm9, %v2508_v53, %v886_v6  ;;  %v1105_v54 = vld [vmem:[#allocation3 + $0x220] sm:$0x3] }
 0x14b   :  { %932 = vst [vmem:[#allocation3 + $0x1a0] sm:$0xc0] %v908_v29  ;;  %v1778_v38 = vpack.c.bf16 %v1105_v54, %v999_v22 }
 0x14c   :  { %v888_v8 = vpop.permute.xlu1 %887 }
 0x14d   :  { %v909_v56 = vsel %vm903_vm9, %v886_v6, %v888_v8  ;;  %v900_v58 = vpop.permute.xlu0 %899  ;;  %v1106_v59 = vld [vmem:[#allocation3 + $0x228] sm:$0x3] }
 0x14e   :  { %933 = vst [vmem:[#allocation3 + $0x1a8] sm:$0xc0] %v909_v56  ;;  %v914_v37 = vsel %vm903_vm9, %v2514_v15, %v900_v58  ;;  %v1775_v55 = vpack.c.bf16 %v1106_v59, %v1000_v1 }
 0x150   :  { %1777 = vmatprep.subr.msk.bf16.mxu1 %vm2405_vm12, %v1775_v55  ;;  %v902_v62 = vpop.permute.xlu1 %901 }
 0x151   :  { %v915_v18 = vsel %vm903_vm9, %v900_v58, %v902_v62  ;;  %1780 = vmatpush1.bf16.msk.msra.mxu1 %vm2405_vm12, %v1778_v38  ;;  %v979_v5 = vpop.permute.xlu0 %978 }
 0x152   :  { %v1001_v60 = vsel %vm996_vm10, %v977_v57, %v979_v5  ;;  %v1089_v12 = vld [vmem:[#allocation3 + $0x1a0] sm:$0xff] }
 0x153   :  { %v1799_v2 = vpack.c.bf16 %v914_v37, %v1089_v12 }
 0x154   :  { %1716 = vmatmul.mubr.msk.f32.vlgmr.msra.gmra.mrb[0].mxu1 %vm996_vm10, %v2429_v41  ;;  %v981_v53 = vpop.permute.xlu1 %980 }
 0x155   :  { %v1002_v13 = vsel %vm996_vm10, %v979_v5, %v981_v53  ;;  %1322 = vmatprep.mubr.f32.mxu1 %v1853_v19  ;;  %v993_v46 = vpop.permute.xlu0 %992  ;;  %v1090_v15 = vld [vmem:[#allocation3 + $0x1a8] sm:$0xff] }
 0x156   :  { %v1007_v3 = vsel %vm996_vm10, %v991_v63, %v993_v46  ;;  %v1797_v26 = vpack.c.bf16 %v915_v18, %v1090_v15 }
 0x157   :  { %1031 = vst [vmem:[#allocation3 + $0x230] sm:$0x3] %v1007_v3 }
 0x158   :  { %1717 = vmatmul.mubr.msk.f32.gmra.mrb[2].mxu1 %vm996_vm10, %v2442_v61  ;;  %v995_v24 = vpop.permute.xlu1 %994  ;;  %1798 = vmatprep.subr.bf16.mxu0 %v1797_v26 }
 0x159   :  { %v1008_v48 = vsel %vm996_vm10, %v993_v46, %v995_v24  ;;  %1328 = vmatprep.mubr.f32.mxu1 %v1853_v19  ;;  %1800 = vmatpush1.bf16.msra.mxu0 %v1799_v2 }
 0x15a   :  { %1032 = vst [vmem:[#allocation3 + $0x238] sm:$0x3] %v1008_v48 }
 0x15c   :  { %1718 = vmatmul.mubr.msk.f32.gmra.mrb[4].mxu1 %vm996_vm10, %v2453_v14 }
 0x15d   :  { %1334 = vmatprep.mubr.f32.mxu1 %v1853_v19 }
 0x15e   :  { %v1107_v27 = vld [vmem:[#allocation3 + $0x230] sm:$0x3] }
 0x15f   :  { %v1804_v20 = vpack.c.bf16 %v1107_v27, %v1001_v60 }
 0x160   :  { %1719 = vmatmul.mubr.msk.f32.gmra.mrb[6].mxu1 %vm996_vm10, %v2464_v16 }
 0x161   :  { %v1108_v4 = vld [vmem:[#allocation3 + $0x238] sm:$0x3]  ;;  %1529 = vmatprep.mubr.f32.mxu1 %v1853_v19 }
 0x162   :  { %v1801_v47 = vpack.c.bf16 %v1108_v4, %v1002_v13 }
 0x164   :  { %1803 = vmatprep.subr.msk.bf16.mxu0 %vm2405_vm12, %v1801_v47 }
 0x165   :  { %1806 = vmatpush1.bf16.msk.msra.mxu0 %vm2405_vm12, %v1804_v20 }
 0x166   :  { %v2579_v11 = vpop.permute.xlu0 %1115 }
 0x168   :  { %1722 = vmatmul.mubr.msk.f32.vlgmr.msra.gmra.mrb[8].mxu0 %vm996_vm10, %v2429_v41 }
 0x169   :  { %1411 = vmatprep.mubr.f32.mxu0 %v1853_v19  ;;  %v2581_v31 = vpop.permute.xlu1 %1120 }
 0x16a   :  { %v2590_v1 = vpop.permute.xlu0 %1130 }
 0x16c   :  { %1723 = vmatmul.mubr.msk.f32.gmra.mrb[10].mxu0 %vm996_vm10, %v2442_v61 }
 0x16d   :  { %1417 = vmatprep.mubr.f32.mxu0 %v1853_v19  ;;  %v2587_v34 = vpop.permute.xlu1 %1125 }
 0x170   :  { %1724 = vmatmul.mubr.msk.f32.gmra.mrb[12].mxu0 %vm996_vm10, %v2453_v14 }
 0x171   :  { %1423 = vmatprep.mubr.f32.mxu0 %v1853_v19 }
 0x174   :  { %1725 = vmatmul.mubr.msk.f32.gmra.mrb[14].mxu0 %vm996_vm10, %v2464_v16 }
 0x1ce   :  { %v1229_v43 = vpop.f32.mrb[0].mxu0 }
 0x1cf   :  { %v1231_v41 = vpop.f32.mrb[1].mxu0  ;;  %v1230_v32 = vadd.f32 %v1229_v43, %v2579_v11 }
 0x1d0   :  { %v1232_v61 = vadd.f32 %v1231_v41, %v2579_v11 }
 0x1d1   :  { %v1430_v14 = vmax.f32 %v1230_v32, 0.0 }
 0x1d2   :  { %v1235_v9 = vpop.f32.mrb[2].mxu0  ;;  %v1431_v45 = vmax.f32 %v1232_v61, 0.0 }
 0x1d3   :  { %v1237_v17 = vpop.f32.mrb[3].mxu0  ;;  %v1236_v28 = vadd.f32 %v1235_v9, %v2581_v31 }
 0x1d4   :  { %v1238_v10 = vadd.f32 %v1237_v17, %v2581_v31 }
 0x1d5   :  { %v1436_v16 = vmax.f32 %v1236_v28, 0.0 }
 0x1d6   :  { %v1437_v33 = vmax.f32 %v1238_v10, 0.0  ;;  %v1241_v51 = vpop.f32.mrb[4].mxu0 }
 0x1d7   :  { %v1243_v35 = vpop.f32.mrb[5].mxu0  ;;  %v1809_v36 = vpack.c.bf16 %v1436_v16, %v1430_v14  ;;  %v1242_v22 = vadd.f32 %v1241_v51, %v2587_v34 }
 0x1d8   :  { %v1807_v57 = vpack.c.bf16 %v1437_v33, %v1431_v45  ;;  %v1244_v39 = vadd.f32 %v1243_v35, %v2587_v34 }
 0x1d9   :  { %v1442_v0 = vmax.f32 %v1242_v22, 0.0 }
 0x1da   :  { %v1247_v25 = vpop.f32.mrb[6].mxu0  ;;  %1808 = vmatprep.subr.bf16.mxu1 %v1807_v57  ;;  %v1443_v23 = vmax.f32 %v1244_v39, 0.0 }
 0x1db   :  { %v1248_v63 = vadd.f32 %v1247_v25, %v2590_v1  ;;  %v1249_v52 = vpop.f32.mrb[7].mxu0  ;;  %1810 = vmatpush1.bf16.msra.mxu1 %v1809_v36 }
 0x1dc   :  { %v1250_v40 = vadd.f32 %v1249_v52, %v2590_v1 }
 0x1dd   :  { %v1448_v21 = vmax.f32 %v1248_v63, 0.0 }
 0x1de   :  { %v1449_v42 = vmax.f32 %v1250_v40, 0.0 }
 0x1df   :  { %v1813_v49 = vpack.c.bf16 %v1448_v21, %v1442_v0 }
 0x1e0   :  { %v1811_v30 = vpack.c.bf16 %v1449_v42, %v1443_v23 }
 0x1e2   :  { %1812 = vmatprep.subr.bf16.mxu1 %v1811_v30 }
 0x1e3   :  { %1814 = vmatpush1.bf16.msra.mxu1 %v1813_v49 }
 0x1e6   :  { %1726 = vmatmul.mubr.msk.f32.vlgmr.msra.gmra.mrb[8].mxu1 %vm1461_vm13, %v2598_v50 }
 0x1e7   :  { %1600 = vmatprep.mubr.f32.mxu1 %v1853_v19 }
 0x227   :  { %v1318_v44 = vpop.f32.mrb[0].mxu1 }
 0x228   :  { %v1319_v7 = vadd.f32 %v1318_v44, %v2579_v11  ;;  %v1320_v6 = vpop.f32.mrb[1].mxu1 }
 0x229   :  { %v1321_v29 = vadd.f32 %v1320_v6, %v2579_v11 }
 0x22a   :  { %v1432_v54 = vmax.f32 %v1319_v7, 0.0 }
 0x22b   :  { %v1324_v8 = vpop.f32.mrb[2].mxu1  ;;  %v1433_v59 = vmax.f32 %v1321_v29, 0.0 }
 0x22c   :  { %v1325_v56 = vadd.f32 %v1324_v8, %v2581_v31  ;;  %v1326_v58 = vpop.f32.mrb[3].mxu1 }
 0x22d   :  { %v1327_v37 = vadd.f32 %v1326_v58, %v2581_v31 }
 0x22e   :  { %v1438_v55 = vmax.f32 %v1325_v56, 0.0 }
 0x22f   :  { %v1439_v38 = vmax.f32 %v1327_v37, 0.0  ;;  %v1330_v62 = vpop.f32.mrb[4].mxu1 }
 0x230   :  { %v1817_v18 = vpack.c.bf16 %v1438_v55, %v1432_v54  ;;  %v1331_v5 = vadd.f32 %v1330_v62, %v2587_v34  ;;  %v1332_v60 = vpop.f32.mrb[5].mxu1 }
 0x231   :  { %v1815_v53 = vpack.c.bf16 %v1439_v38, %v1433_v59  ;;  %v1333_v12 = vadd.f32 %v1332_v60, %v2587_v34 }
 0x232   :  { %v1444_v46 = vmax.f32 %v1331_v5, 0.0 }
 0x233   :  { %v1336_v13 = vpop.f32.mrb[6].mxu1  ;;  %1816 = vmatprep.subr.bf16.mxu1 %v1815_v53  ;;  %v1445_v26 = vmax.f32 %v1333_v12, 0.0 }
 0x234   :  { %v1337_v15 = vadd.f32 %v1336_v13, %v2590_v1  ;;  %v1338_v3 = vpop.f32.mrb[7].mxu1  ;;  %1818 = vmatpush1.bf16.msra.mxu1 %v1817_v18 }
 0x235   :  { %v1339_v2 = vadd.f32 %v1338_v3, %v2590_v1 }
 0x236   :  { %v1450_v24 = vmax.f32 %v1337_v15, 0.0 }
 0x237   :  { %v1451_v48 = vmax.f32 %v1339_v2, 0.0 }
 0x238   :  { %v1821_v27 = vpack.c.bf16 %v1450_v24, %v1444_v46 }
 0x239   :  { %v1819_v4 = vpack.c.bf16 %v1451_v48, %v1445_v26 }
 0x23b   :  { %v1407_v47 = vpop.f32.mrb[8].mxu0  ;;  %1820 = vmatprep.subr.bf16.mxu1 %v1819_v4 }
 0x23c   :  { %v1409_v20 = vpop.f32.mrb[9].mxu0  ;;  %1822 = vmatpush1.bf16.msra.mxu1 %v1821_v27  ;;  %v1408_v43 = vadd.f32 %v1407_v47, %v2579_v11 }
 0x23d   :  { %v1410_v41 = vadd.f32 %v1409_v20, %v2579_v11 }
 0x23e   :  { %v1434_v28 = vmax.f32 %v1408_v43, 0.0 }
 0x23f   :  { %v1413_v32 = vpop.f32.mrb[10].mxu0  ;;  %1727 = vmatmul.mubr.msk.f32.vlgmr.msra.gmra.mrb[10].mxu1 %vm1461_vm13, %v2598_v50  ;;  %v1435_v10 = vmax.f32 %v1410_v41, 0.0 }
 0x240   :  { %v1414_v61 = vadd.f32 %v1413_v32, %v2581_v31  ;;  %v1415_v9 = vpop.f32.mrb[11].mxu0  ;;  %1671 = vmatprep.mubr.f32.mxu1 %v1853_v19 }
 0x241   :  { %v1416_v17 = vadd.f32 %v1415_v9, %v2581_v31 }
 0x242   :  { %v1440_v14 = vmax.f32 %v1414_v61, 0.0 }
 0x243   :  { %v1441_v45 = vmax.f32 %v1416_v17, 0.0  ;;  %v1419_v16 = vpop.f32.mrb[12].mxu0 }
 0x244   :  { %v1825_v33 = vpack.c.bf16 %v1440_v14, %v1434_v28  ;;  %v1421_v51 = vpop.f32.mrb[13].mxu0  ;;  %v1420_v11 = vadd.f32 %v1419_v16, %v2587_v34 }
 0x245   :  { %v1823_v35 = vpack.c.bf16 %v1441_v45, %v1435_v10  ;;  %v1422_v36 = vadd.f32 %v1421_v51, %v2587_v34  ;;  %v1459_v34 = vpop.permute.xlu1 %1458 }
 0x246   :  { %v1446_v31 = vmax.f32 %v1420_v11, 0.0 }
 0x247   :  { %v1425_v22 = vpop.f32.mrb[14].mxu0  ;;  %1824 = vmatprep.subr.bf16.mxu1 %v1823_v35  ;;  %v1447_v63 = vmax.f32 %v1422_v36, 0.0 }
 0x248   :  { %v1426_v57 = vadd.f32 %v1425_v22, %v2590_v1  ;;  %v1427_v39 = vpop.f32.mrb[15].mxu0  ;;  %1826 = vmatpush1.bf16.msra.mxu1 %v1825_v33 }
 0x249   :  { %v1428_v19 = vadd.f32 %v1427_v39, %v2590_v1 }
 0x24a   :  { %v1452_v25 = vmax.f32 %v1426_v57, 0.0 }
 0x24b   :  { %v1453_v52 = vmax.f32 %v1428_v19, 0.0 }
 0x24c   :  { %v1829_v0 = vpack.c.bf16 %v1452_v25, %v1446_v31 }
 0x24d   :  { %v1827_v40 = vpack.c.bf16 %v1453_v52, %v1447_v63 }
 0x24f   :  { %1828 = vmatprep.subr.bf16.mxu1 %v1827_v40 }
 0x250   :  { %1830 = vmatpush1.bf16.msra.mxu1 %v1829_v0 }
 0x253   :  { %1728 = vmatmul.mubr.msk.f32.vlgmr.msra.gmra.mrb[12].mxu1 %vm1461_vm13, %v2598_v50 }
 0x2b9   :  { %v1531_v23 = vpop.f32.mrb[8].mxu1 }
 0x2ba   :  { %v1532_v21 = vadd.f32 %v1531_v23, %v1459_v34  ;;  %v1533_v42 = vpop.f32.mrb[9].mxu1 }
 0x2bb   :  { %v1534_v49 = vadd.f32 %v1533_v42, %v1459_v34 }
 0x2bd   :  { %v1684_v30 = vcombine.low %v1532_v21, %v1534_v49 }
 0x2bf   :  { %1690 = vst [vmem:[%s2639_s6] sm:$0x77] %v1684_v30 }
 0x312   :  { %v1602_v1 = vpop.f32.mrb[10].mxu1 }
 0x313   :  { %v1603_v44 = vadd.f32 %v1602_v1, %v1459_v34  ;;  %v1604_v7 = vpop.f32.mrb[11].mxu1 }
 0x314   :  { %v1605_v6 = vadd.f32 %v1604_v7, %v1459_v34 }
 0x316   :  { %v1685_v29 = vcombine.low %v1603_v44, %v1605_v6 }
 0x318   :  { %1691 = vst [vmem:[%s2639_s6 + $0x8] sm:$0x77] %v1685_v29 }
 0x326   :  { %v1673_v50 = vpop.f32.mrb[12].mxu1 }
 0x327   :  { %v1674_v8 = vadd.f32 %v1673_v50, %v1459_v34  ;;  %v1675_v54 = vpop.f32.mrb[13].mxu1 }
 0x328   :  { %v1676_v56 = vadd.f32 %v1675_v54, %v1459_v34 }
 0x32a   :  { %v1686_v58 = vcombine.low %v1674_v8, %v1676_v56 }
 0x32c   :  { %1692 = vst [vmem:[%s2639_s6 + $0x10] sm:$0x77] %v1686_v58 }

</bundles_post_ra>
